<compile_context>
chip_gen: v5e
topology: v5e:2x2
jax: 0.10.0
libtpu: 0.0.40
codegen_flags: <defaults>
</compile_context>

<pallas_src>
import functools

import jax
import jax.numpy as jnp
from jax import lax
from jax.experimental import pallas as pl
from jax.experimental.pallas import tpu as pltpu


def _round_up(x, m):
    return ((x + m - 1) // m) * m


def ffn_kernel(a0_ref, xr_ref, m_ref, w0_ref, b0_ref, w1_ref, b1_ref, g_ref, be_ref,
               o_ref, *, kernel_size, tq, c_real, compact):
    """One (batch, time-tile) step.

    a0_ref : conv_0 operand window, bf16.
             compact: (E, 128) im2col strip (mask already multiplied, taps packed).
             general: (E2, Cp) masked-x window (halo 2*PAD each side).
    xr_ref : (tq, Cp) f32 residual tile (unmasked x).
    m_ref  : (E, 1)  f32 mask window (tile + PAD halo each side).
    w0_ref : compact: (128, 128) bf16 packed weight; general: (K, Cp, Cp) bf16.
    w1_ref : (K, Cp, Cp) bf16.
    b*/g/be: (1, Cp) f32.   o_ref: (tq, Cp) f32.
    """
    K = kernel_size
    PAD = (K - 1) // 2
    E = tq + 2 * PAD
    Cp = xr_ref.shape[-1]

    mE = m_ref[...]                                               # (E, 1) f32

    # ---- conv_0 on (x * mask) -> h over E rows (tile + PAD halo) ----
    if compact:
        # single 128-deep MXU dot; operand packed in the wrapper
        acc0 = jnp.dot(a0_ref[...], w0_ref[...], preferred_element_type=jnp.float32)
    else:
        a0 = a0_ref[...]                                          # (E2, Cp) bf16
        acc0 = jnp.dot(lax.slice_in_dim(a0, 0, E, axis=0), w0_ref[0],
                       preferred_element_type=jnp.float32)
        for k in range(1, K):                                     # per-tap dots, no concat
            acc0 = acc0 + jnp.dot(lax.slice_in_dim(a0, k, k + E, axis=0), w0_ref[k],
                                  preferred_element_type=jnp.float32)
    h = jnp.maximum(acc0 + b0_ref[...], 0.0)                      # (E, Cp) f32
    # TODO(synk): dropout is inference-mode identity (no in-kernel RNG / training parity).

    # ---- conv_1 on (h * mask) for the tile's own rows ----
    hm = (h * mE).astype(jnp.bfloat16)                            # (E, Cp) bf16
    acc1 = jnp.dot(lax.slice_in_dim(hm, 0, tq, axis=0), w1_ref[0],
                   preferred_element_type=jnp.float32)
    for k in range(1, K):
        acc1 = acc1 + jnp.dot(lax.slice_in_dim(hm, k, k + tq, axis=0), w1_ref[k],
                              preferred_element_type=jnp.float32)

    # ---- residual + centered LayerNorm over the REAL channel count ----
    y = acc1 + b1_ref[...] + xr_ref[...]                          # (tq, Cp) f32; padded lanes are 0
    inv_c = 1.0 / c_real
    mean = jnp.sum(y, axis=-1, keepdims=True) * inv_c
    yc = y - mean
    if c_real != Cp:                                              # zero padded lanes before variance
        cmask = (lax.broadcasted_iota(jnp.int32, (1, Cp), 1) < c_real).astype(jnp.float32)
        yc = yc * cmask
    var = jnp.sum(yc * yc, axis=-1, keepdims=True) * inv_c
    yn = yc * lax.rsqrt(var + 1e-5) * g_ref[...] + be_ref[...]    # padded lanes -> 0 (gamma/beta = 0)

    m_t = lax.slice_in_dim(mE, PAD, PAD + tq, axis=0)             # (tq, 1)
    o_ref[...] = (yn * m_t).astype(o_ref.dtype)


def ffn_forward_nct(x_nct, mask_n1t, params, tq=None):
    """PyTorch-convention entry: x [B, C, T], masks [B, 1, T] -> [B, C, T] (inference)."""
    w0, b0, w1, b1, gamma, beta = params
    B, C, T = x_nct.shape
    K = int(w0.shape[0])
    assert K % 2 == 1, "exact 'same' padding requires odd kernel_size (matches PyTorch Conv1d)"
    PAD = (K - 1) // 2

    Cp = max(128, _round_up(C, 128))            # lane-dense channel padding
    compact = (K * C <= 128)                    # all taps fit one 128-lane contraction block

    # ---- time tile: large tiles amortize the ~0.35us/step overhead; pad T, don't assert
    if tq is None:
        tq = min(_round_up(T, 8), 512)
        if B == 1 and T > 8:
            tq = min(tq, max(8, _round_up((T + 1) // 2, 8)))      # >= 2 grid steps for 2 TCs
    tq = max(8, _round_up(int(tq), 8))
    nt = max(1, -(-T // tq))
    Tp = nt * tq
    E = tq + 2 * PAD                              # h rows needed per tile (conv_1 taps)
    E2 = tq + 4 * PAD                             # x rows needed per tile (general conv_0)

    # ---- BTC layout; zero-pad time to Tp, channels to Cp ----
    x_btc = jnp.pad(jnp.transpose(x_nct, (0, 2, 1)).astype(jnp.float32),
                    ((0, 0), (0, Tp - T), (0, 0)))                # (B, Tp, C)
    m_bt1 = jnp.pad(jnp.transpose(mask_n1t, (0, 2, 1)).astype(jnp.float32),
                    ((0, 0), (0, Tp - T), (0, 0)))                # (B, Tp, 1)

    # residual tiles (unmasked x, f32, no halo)
    xres = jnp.pad(x_btc, ((0, 0), (0, 0), (0, Cp - C))).reshape(B, nt, tq, Cp)

    # mask windows: E rows per tile, zero halo beyond the sequence (== conv zero padding)
    m_halo = jnp.pad(m_bt1, ((0, 0), (PAD, PAD), (0, 0)))
    m_win = jnp.stack([m_halo[:, t * tq: t * tq + E] for t in range(nt)], axis=1)   # (B,nt,E,1)

    # conv_0 operand: mask pre-multiplied in the wrapper (no in-kernel broadcast), bf16
    xm = x_btc * m_bt1
    if compact:
        xm_p = jnp.pad(xm, ((0, 0), (2 * PAD, 2 * PAD), (0, 0)))                    # (B,Tp+4P,C)
        ic = jnp.concatenate([xm_p[:, k: k + Tp + 2 * PAD] for k in range(K)], axis=-1)
        ic = jnp.pad(ic, ((0, 0), (0, 0), (0, 128 - K * C)))                        # (B,Tp+2P,128)
        a0 = jnp.stack([ic[:, t * tq: t * tq + E] for t in range(nt)],
                       axis=1).astype(jnp.bfloat16)                                 # (B,nt,E,128)
        R0, W0 = E, 128
    else:
        xm_p = jnp.pad(xm, ((0, 0), (2 * PAD, 2 * PAD), (0, Cp - C)))
        a0 = jnp.stack([xm_p[:, t * tq: t * tq + E2] for t in range(nt)],
                       axis=1).astype(jnp.bfloat16)                                 # (B,nt,E2,Cp)
        R0, W0 = E2, Cp

    # ---- constants ----
    def pack_w_general(w):                       # (K, Cin, Cout) -> (K, Cp, Cp) bf16
        return jnp.pad(jnp.asarray(w, jnp.float32),
                       ((0, 0), (0, Cp - C), (0, Cp - C))).astype(jnp.bfloat16)

    def pack_w_compact(w):                       # (K, Cin, Cout) -> (128, 128) bf16, row = k*C + c_in
        wf = jnp.asarray(w, jnp.float32).reshape(K * C, C)
        return jnp.pad(wf, ((0, 128 - K * C), (0, 128 - C))).astype(jnp.bfloat16)

    def pack_v(v):                               # (C,) -> (1, Cp) f32
        return jnp.pad(jnp.asarray(v, jnp.float32).reshape(1, C), ((0, 0), (0, Cp - C)))

    w0r = pack_w_compact(w0) if compact else pack_w_general(w0)
    w1r = pack_w_general(w1)
    b0r, b1r, gr, ber = pack_v(b0), pack_v(b1), pack_v(gamma), pack_v(beta)

    # ---- VMEM budget: double-buffered per-step windows + constants, clamped for v7x ----
    per_step = 2 * (R0 * W0 * 2 + tq * Cp * 4 + E * 128 * 4 + tq * Cp * 4)
    const_bytes = (w0r.size + w1r.size) * 2 + 4 * Cp * 4
    vmem_limit = int(min(64 * 1024 * 1024, max(32 * 1024 * 1024, 2 * (per_step + const_bytes))))

    kernel = functools.partial(ffn_kernel, kernel_size=K, tq=tq, c_real=C, compact=compact)
    const2 = lambda b, t: (0, 0)
    const3 = lambda b, t: (0, 0, 0)

    def build_in_specs(const_mode):
        def cspec(shape, idx):
            if const_mode is None:
                return pl.BlockSpec(shape, idx)
            return pl.BlockSpec(shape, idx, pipeline_mode=const_mode)
        w0_spec = cspec((128, 128), const2) if compact else cspec((K, Cp, Cp), const3)
        return [
            pl.BlockSpec((None, None, R0, W0), lambda b, t: (b, t, 0, 0)),   # conv_0 operand window
            pl.BlockSpec((None, None, tq, Cp), lambda b, t: (b, t, 0, 0)),   # residual tile (f32)
            pl.BlockSpec((None, None, E, 1), lambda b, t: (b, t, 0, 0)),     # mask window
            w0_spec,                                                          # w0
            cspec((1, Cp), const2),                                           # b0
            cspec((K, Cp, Cp), const3),                                       # w1
            cspec((1, Cp), const2),                                           # b1
            cspec((1, Cp), const2),                                           # gamma
            cspec((1, Cp), const2),                                           # beta
        ]

    def run(const_mode):
        return pl.pallas_call(
            kernel,
            out_shape=jax.ShapeDtypeStruct((B, Tp, Cp), jnp.float32),
            grid=(B, nt),
            in_specs=build_in_specs(const_mode),
            out_specs=pl.BlockSpec((None, tq, Cp), lambda b, t: (b, t, 0)),
            compiler_params=pltpu.CompilerParams(
                dimension_semantics=("parallel", "parallel"),
                vmem_limit_bytes=vmem_limit,
            ),
        )(a0, xres, m_win, w0r, b0r, w1r, b1r, gr, ber)

    try:
        # Constants are identical every grid step -> single-buffer them to free VMEM.
        y_p = run(pl.Buffered(1))
    except Exception:
        # Fallback: default double-buffering if this Pallas build rejects pipeline_mode here.
        y_p = run(None)

    # Drop time/channel padding, back to PyTorch NCT layout.
    return jnp.transpose(y_p[:, :T, :C], (0, 2, 1))


def ffn_reference_nct(x_nct, mask_n1t, params):
    """Pure-JAX reference with matching numerics (bf16 matmul operands, f32 accumulation)."""
    w0, b0, w1, b1, gamma, beta = params
    K = w0.shape[0]
    PAD = (K - 1) // 2
    x = jnp.transpose(x_nct, (0, 2, 1)).astype(jnp.float32)
    m = jnp.transpose(mask_n1t, (0, 2, 1)).astype(jnp.float32)
    T = x.shape[1]

    def conv(inp, w, b):
        p = jnp.pad(inp, ((0, 0), (PAD, PAD), (0, 0))).astype(jnp.bfloat16)
        out = jnp.asarray(b, jnp.float32).reshape(1, 1, -1) + jnp.zeros(inp.shape, jnp.float32)
        for k in range(K):
            out = out + jnp.einsum('bti,io->bto', p[:, k:k + T], w[k].astype(jnp.bfloat16),
                                   preferred_element_type=jnp.float32)
        return out

    h = jnp.maximum(conv(x * m, w0, b0), 0.0)
    y = conv(h * m, w1, b1) + x
    mean = y.mean(-1, keepdims=True)
    var = ((y - mean) ** 2).mean(-1, keepdims=True)
    yn = (y - mean) * lax.rsqrt(var + 1e-5)
    yn = yn * jnp.asarray(gamma, jnp.float32).reshape(1, 1, -1) \
        + jnp.asarray(beta, jnp.float32).reshape(1, 1, -1)
    return jnp.transpose(yn * m, (0, 2, 1))


if __name__ == "__main__":
    B, C, T, K = 2, 16, 70, 5           # small shapes; K*C=80 <= 128 -> compact contraction path

    key = jax.random.PRNGKey(0)
    k_x, k_w0, k_b0, k_w1, k_b1 = jax.random.split(key, 5)

    # Deterministic "xavier_uniform"-style init (w_init_gain: relu / linear).
    fan = C * K
    lim0 = (2.0 ** 0.5) * (6.0 / (2 * fan)) ** 0.5   # gain('relu') = sqrt(2)
    lim1 = 1.0 * (6.0 / (2 * fan)) ** 0.5            # gain('linear') = 1
    # Weight layout: (K, C_in, C_out)  <->  torch conv weight [out, in, k] transposed.
    w0 = jax.random.uniform(k_w0, (K, C, C), jnp.float32, -lim0, lim0)
    b0 = jax.random.uniform(k_b0, (C,), jnp.float32, -0.1, 0.1)
    w1 = jax.random.uniform(k_w1, (K, C, C), jnp.float32, -lim1, lim1)
    b1 = jax.random.uniform(k_b1, (C,), jnp.float32, -0.1, 0.1)
    gamma = jnp.ones((C,), jnp.float32)
    beta = jnp.zeros((C,), jnp.float32)
    params = (w0, b0, w1, b1, gamma, beta)

    # Inputs in PyTorch layout: x [B, C, T], masks [B, 1, T] (valid-length mask).
    x_nct = jax.random.normal(k_x, (B, C, T), jnp.float32)
    lengths = jnp.array([T, T - 17], jnp.int32)
    mask_n1t = (jnp.arange(T)[None, None, :] < lengths[:, None, None]).astype(jnp.float32)

    out = jax.block_until_ready(ffn_forward_nct(x_nct, mask_n1t, params))   # auto tq (=72, nt=1)
    assert out.shape == (B, C, T)

    # Cross-check against the pure-JAX reference (same bf16-matmul numerics).
    ref = ffn_reference_nct(x_nct, mask_n1t, params)
    max_err = float(jnp.max(jnp.abs(out - ref)))
    assert jnp.allclose(out, ref, atol=1e-2, rtol=1e-2), f"mismatch vs reference (max err {max_err})"

    print("KERNEL_OK")
</pallas_src>

<mosaic_0001>
module attributes {stable_mosaic.version = 11 : i64} {
  func.func @ffn_kernel(%arg0: i32, %arg1: i32, %arg2: memref<1x1x76x128xbf16, #tpu.memory_space<vmem>>, %arg3: memref<1x1x72x128xf32, #tpu.memory_space<vmem>>, %arg4: memref<1x1x76x1xf32, #tpu.memory_space<vmem>>, %arg5: memref<128x128xbf16, #tpu.memory_space<vmem>>, %arg6: memref<1x128xf32, #tpu.memory_space<vmem>>, %arg7: memref<5x128x128xbf16, #tpu.memory_space<vmem>>, %arg8: memref<1x128xf32, #tpu.memory_space<vmem>>, %arg9: memref<1x128xf32, #tpu.memory_space<vmem>>, %arg10: memref<1x128xf32, #tpu.memory_space<vmem>>, %arg11: memref<1x72x128xf32, #tpu.memory_space<vmem>>) attributes {dimension_semantics = [#tpu.dimension_semantics<parallel>, #tpu.dimension_semantics<parallel>], iteration_bounds = array<i64: 2, 1>, scalar_prefetch = 0 : i64, scratch_operands = 0 : i64, tpu.core_type = #tpu.core_type<tc>, window_params = [{transform_indices = @transform_0, window_bounds = array<i64: 1, 1, 76, 128>}, {transform_indices = @transform_1, window_bounds = array<i64: 1, 1, 72, 128>}, {transform_indices = @transform_2, window_bounds = array<i64: 1, 1, 76, 1>}, {pipeline_mode = #tpu.pipeline_mode<synchronous>, transform_indices = @transform_3, window_bounds = array<i64: 128, 128>}, {pipeline_mode = #tpu.pipeline_mode<synchronous>, transform_indices = @transform_4, window_bounds = array<i64: 1, 128>}, {pipeline_mode = #tpu.pipeline_mode<synchronous>, transform_indices = @transform_5, window_bounds = array<i64: 5, 128, 128>}, {pipeline_mode = #tpu.pipeline_mode<synchronous>, transform_indices = @transform_6, window_bounds = array<i64: 1, 128>}, {pipeline_mode = #tpu.pipeline_mode<synchronous>, transform_indices = @transform_7, window_bounds = array<i64: 1, 128>}, {pipeline_mode = #tpu.pipeline_mode<synchronous>, transform_indices = @transform_8, window_bounds = array<i64: 1, 128>}, {transform_indices = @transform_9, window_bounds = array<i64: 1, 72, 128>}]} {
    %c0 = arith.constant 0 : index
    %c0_0 = arith.constant 0 : index
    %c0_1 = arith.constant 0 : index
    %c0_2 = arith.constant 0 : index
    %0 = vector.load %arg4[%c0, %c0_0, %c0_1, %c0_2] : memref<1x1x76x1xf32, #tpu.memory_space<vmem>>, vector<1x1x76x1xf32>
    %1 = vector.shape_cast %0 : vector<1x1x76x1xf32> to vector<76x1xf32>
    %c0_3 = arith.constant 0 : index
    %c0_4 = arith.constant 0 : index
    %c0_5 = arith.constant 0 : index
    %c0_6 = arith.constant 0 : index
    %2 = vector.load %arg2[%c0_3, %c0_4, %c0_5, %c0_6] : memref<1x1x76x128xbf16, #tpu.memory_space<vmem>>, vector<1x1x76x128xbf16>
    %3 = vector.shape_cast %2 : vector<1x1x76x128xbf16> to vector<76x128xbf16>
    %c0_7 = arith.constant 0 : index
    %c0_8 = arith.constant 0 : index
    %4 = vector.load %arg5[%c0_7, %c0_8] : memref<128x128xbf16, #tpu.memory_space<vmem>>, vector<128x128xbf16>
    %cst = arith.constant dense<0.000000e+00> : vector<76x128xf32>
    %5 = tpu.matmul %3, %4, %cst {dimension_numbers = #tpu.dot_dimension_numbers<[1], [0], [0], [1], [0, 0, 1, 1], [], []>} : vector<76x128xbf16>, vector<128x128xbf16>, vector<76x128xf32> -> vector<76x128xf32>
    %c0_9 = arith.constant 0 : index
    %c0_10 = arith.constant 0 : index
    %6 = vector.load %arg6[%c0_9, %c0_10] : memref<1x128xf32, #tpu.memory_space<vmem>>, vector<1x128xf32>
    %7 = vector.broadcast %6 : vector<1x128xf32> to vector<76x128xf32>
    %8 = arith.addf %5, %7 : vector<76x128xf32>
    %cst_11 = arith.constant 0.000000e+00 : f32
    %9 = vector.broadcast %cst_11 : f32 to vector<76x128xf32>
    %10 = arith.maximumf %8, %9 : vector<76x128xf32>
    %11 = vector.broadcast %1 : vector<76x1xf32> to vector<76x128xf32>
    %12 = arith.mulf %10, %11 : vector<76x128xf32>
    %13 = arith.truncf %12 : vector<76x128xf32> to vector<76x128xbf16>
    %14 = vector.extract_strided_slice %13 {offsets = [0, 0], sizes = [72, 128], strides = [1, 1]} : vector<76x128xbf16> to vector<72x128xbf16>
    %c0_12 = arith.constant 0 : index
    %c0_13 = arith.constant 0 : index
    %c0_14 = arith.constant 0 : index
    %15 = vector.load %arg7[%c0_12, %c0_13, %c0_14] : memref<5x128x128xbf16, #tpu.memory_space<vmem>>, vector<1x128x128xbf16>
    %16 = vector.shape_cast %15 : vector<1x128x128xbf16> to vector<128x128xbf16>
    %cst_15 = arith.constant dense<0.000000e+00> : vector<72x128xf32>
    %17 = tpu.matmul %14, %16, %cst_15 {dimension_numbers = #tpu.dot_dimension_numbers<[1], [0], [0], [1], [0, 0, 1, 1], [], []>} : vector<72x128xbf16>, vector<128x128xbf16>, vector<72x128xf32> -> vector<72x128xf32>
    %18 = vector.extract_strided_slice %13 {offsets = [1, 0], sizes = [72, 128], strides = [1, 1]} : vector<76x128xbf16> to vector<72x128xbf16>
    %c1 = arith.constant 1 : index
    %c0_16 = arith.constant 0 : index
    %c0_17 = arith.constant 0 : index
    %19 = vector.load %arg7[%c1, %c0_16, %c0_17] : memref<5x128x128xbf16, #tpu.memory_space<vmem>>, vector<1x128x128xbf16>
    %20 = vector.shape_cast %19 : vector<1x128x128xbf16> to vector<128x128xbf16>
    %cst_18 = arith.constant dense<0.000000e+00> : vector<72x128xf32>
    %21 = tpu.matmul %18, %20, %cst_18 {dimension_numbers = #tpu.dot_dimension_numbers<[1], [0], [0], [1], [0, 0, 1, 1], [], []>} : vector<72x128xbf16>, vector<128x128xbf16>, vector<72x128xf32> -> vector<72x128xf32>
    %22 = arith.addf %17, %21 : vector<72x128xf32>
    %23 = vector.extract_strided_slice %13 {offsets = [2, 0], sizes = [72, 128], strides = [1, 1]} : vector<76x128xbf16> to vector<72x128xbf16>
    %c2 = arith.constant 2 : index
    %c0_19 = arith.constant 0 : index
    %c0_20 = arith.constant 0 : index
    %24 = vector.load %arg7[%c2, %c0_19, %c0_20] : memref<5x128x128xbf16, #tpu.memory_space<vmem>>, vector<1x128x128xbf16>
    %25 = vector.shape_cast %24 : vector<1x128x128xbf16> to vector<128x128xbf16>
    %cst_21 = arith.constant dense<0.000000e+00> : vector<72x128xf32>
    %26 = tpu.matmul %23, %25, %cst_21 {dimension_numbers = #tpu.dot_dimension_numbers<[1], [0], [0], [1], [0, 0, 1, 1], [], []>} : vector<72x128xbf16>, vector<128x128xbf16>, vector<72x128xf32> -> vector<72x128xf32>
    %27 = arith.addf %22, %26 : vector<72x128xf32>
    %28 = vector.extract_strided_slice %13 {offsets = [3, 0], sizes = [72, 128], strides = [1, 1]} : vector<76x128xbf16> to vector<72x128xbf16>
    %c3 = arith.constant 3 : index
    %c0_22 = arith.constant 0 : index
    %c0_23 = arith.constant 0 : index
    %29 = vector.load %arg7[%c3, %c0_22, %c0_23] : memref<5x128x128xbf16, #tpu.memory_space<vmem>>, vector<1x128x128xbf16>
    %30 = vector.shape_cast %29 : vector<1x128x128xbf16> to vector<128x128xbf16>
    %cst_24 = arith.constant dense<0.000000e+00> : vector<72x128xf32>
    %31 = tpu.matmul %28, %30, %cst_24 {dimension_numbers = #tpu.dot_dimension_numbers<[1], [0], [0], [1], [0, 0, 1, 1], [], []>} : vector<72x128xbf16>, vector<128x128xbf16>, vector<72x128xf32> -> vector<72x128xf32>
    %32 = arith.addf %27, %31 : vector<72x128xf32>
    %33 = vector.extract_strided_slice %13 {offsets = [4, 0], sizes = [72, 128], strides = [1, 1]} : vector<76x128xbf16> to vector<72x128xbf16>
    %c4 = arith.constant 4 : index
    %c0_25 = arith.constant 0 : index
    %c0_26 = arith.constant 0 : index
    %34 = vector.load %arg7[%c4, %c0_25, %c0_26] : memref<5x128x128xbf16, #tpu.memory_space<vmem>>, vector<1x128x128xbf16>
    %35 = vector.shape_cast %34 : vector<1x128x128xbf16> to vector<128x128xbf16>
    %cst_27 = arith.constant dense<0.000000e+00> : vector<72x128xf32>
    %36 = tpu.matmul %33, %35, %cst_27 {dimension_numbers = #tpu.dot_dimension_numbers<[1], [0], [0], [1], [0, 0, 1, 1], [], []>} : vector<72x128xbf16>, vector<128x128xbf16>, vector<72x128xf32> -> vector<72x128xf32>
    %37 = arith.addf %32, %36 : vector<72x128xf32>
    %c0_28 = arith.constant 0 : index
    %c0_29 = arith.constant 0 : index
    %38 = vector.load %arg8[%c0_28, %c0_29] : memref<1x128xf32, #tpu.memory_space<vmem>>, vector<1x128xf32>
    %39 = vector.broadcast %38 : vector<1x128xf32> to vector<72x128xf32>
    %40 = arith.addf %37, %39 : vector<72x128xf32>
    %c0_30 = arith.constant 0 : index
    %c0_31 = arith.constant 0 : index
    %c0_32 = arith.constant 0 : index
    %c0_33 = arith.constant 0 : index
    %41 = vector.load %arg3[%c0_30, %c0_31, %c0_32, %c0_33] : memref<1x1x72x128xf32, #tpu.memory_space<vmem>>, vector<1x1x72x128xf32>
    %42 = vector.shape_cast %41 : vector<1x1x72x128xf32> to vector<72x128xf32>
    %43 = arith.addf %40, %42 : vector<72x128xf32>
    %cst_34 = arith.constant dense<0.000000e+00> : vector<72xf32>
    %44 = vector.multi_reduction <add>, %43, %cst_34 [1] : vector<72x128xf32> to vector<72xf32>
    %45 = vector.shape_cast %44 : vector<72xf32> to vector<72x1xf32>
    %cst_35 = arith.constant 6.250000e-02 : f32
    %46 = vector.broadcast %cst_35 : f32 to vector<72x1xf32>
    %47 = arith.mulf %45, %46 : vector<72x1xf32>
    %48 = vector.broadcast %47 : vector<72x1xf32> to vector<72x128xf32>
    %49 = arith.subf %43, %48 : vector<72x128xf32>
    %50 = tpu.iota {dimensions = array<i32: 1>} : vector<1x128xi32>
    %c16_i32 = arith.constant 16 : i32
    %51 = vector.broadcast %c16_i32 : i32 to vector<1x128xi32>
    %52 = arith.cmpi slt, %50, %51 : vector<1x128xi32>
    %53 = arith.extui %52 : vector<1x128xi1> to vector<1x128xi32>
    %54 = arith.sitofp %53 : vector<1x128xi32> to vector<1x128xf32>
    %55 = vector.broadcast %54 : vector<1x128xf32> to vector<72x128xf32>
    %56 = arith.mulf %49, %55 : vector<72x128xf32>
    %57 = arith.mulf %56, %56 : vector<72x128xf32>
    %cst_36 = arith.constant dense<0.000000e+00> : vector<72xf32>
    %58 = vector.multi_reduction <add>, %57, %cst_36 [1] : vector<72x128xf32> to vector<72xf32>
    %59 = vector.shape_cast %58 : vector<72xf32> to vector<72x1xf32>
    %cst_37 = arith.constant 6.250000e-02 : f32
    %60 = vector.broadcast %cst_37 : f32 to vector<72x1xf32>
    %61 = arith.mulf %59, %60 : vector<72x1xf32>
    %cst_38 = arith.constant 9.99999974E-6 : f32
    %62 = vector.broadcast %cst_38 : f32 to vector<72x1xf32>
    %63 = arith.addf %61, %62 : vector<72x1xf32>
    %64 = math.rsqrt %63 : vector<72x1xf32>
    %65 = vector.broadcast %64 : vector<72x1xf32> to vector<72x128xf32>
    %66 = arith.mulf %56, %65 : vector<72x128xf32>
    %c0_39 = arith.constant 0 : index
    %c0_40 = arith.constant 0 : index
    %67 = vector.load %arg9[%c0_39, %c0_40] : memref<1x128xf32, #tpu.memory_space<vmem>>, vector<1x128xf32>
    %68 = vector.broadcast %67 : vector<1x128xf32> to vector<72x128xf32>
    %69 = arith.mulf %66, %68 : vector<72x128xf32>
    %c0_41 = arith.constant 0 : index
    %c0_42 = arith.constant 0 : index
    %70 = vector.load %arg10[%c0_41, %c0_42] : memref<1x128xf32, #tpu.memory_space<vmem>>, vector<1x128xf32>
    %71 = vector.broadcast %70 : vector<1x128xf32> to vector<72x128xf32>
    %72 = arith.addf %69, %71 : vector<72x128xf32>
    %73 = vector.extract_strided_slice %1 {offsets = [2, 0], sizes = [72, 1], strides = [1, 1]} : vector<76x1xf32> to vector<72x1xf32>
    %74 = vector.broadcast %73 : vector<72x1xf32> to vector<72x128xf32>
    %75 = arith.mulf %72, %74 : vector<72x128xf32>
    %c0_43 = arith.constant 0 : index
    %c0_44 = arith.constant 0 : index
    %c0_45 = arith.constant 0 : index
    %76 = vector.load %arg11[%c0_43, %c0_44, %c0_45] : memref<1x72x128xf32, #tpu.memory_space<vmem>>, vector<1x72x128xf32>
    %77 = vector.shape_cast %76 : vector<1x72x128xf32> to vector<72x128xf32>
    %78 = vector.shape_cast %75 : vector<72x128xf32> to vector<1x72x128xf32>
    tpu.vector_store %arg11[%c0_43, %c0_44, %c0_45], %78 {strides = array<i32>} : memref<1x72x128xf32, #tpu.memory_space<vmem>>, vector<1x72x128xf32>,
    return
  }
  func.func @transform_0(%arg0: i32, %arg1: i32) -> (i32, i32, i32, i32) {
    %c0_i32 = arith.constant 0 : i32
    %c0_i32_0 = arith.constant 0 : i32
    %c0_i32_1 = arith.constant 0 : i32
    return %arg0, %arg1, %c0_i32, %c0_i32_0 : i32, i32, i32, i32
  }
  func.func @transform_1(%arg0: i32, %arg1: i32) -> (i32, i32, i32, i32) {
    %c0_i32 = arith.constant 0 : i32
    %c0_i32_0 = arith.constant 0 : i32
    %c0_i32_1 = arith.constant 0 : i32
    return %arg0, %arg1, %c0_i32, %c0_i32_0 : i32, i32, i32, i32
  }
  func.func @transform_2(%arg0: i32, %arg1: i32) -> (i32, i32, i32, i32) {
    %c0_i32 = arith.constant 0 : i32
    %c0_i32_0 = arith.constant 0 : i32
    %c0_i32_1 = arith.constant 0 : i32
    return %arg0, %arg1, %c0_i32, %c0_i32_0 : i32, i32, i32, i32
  }
  func.func @transform_3(%arg0: i32, %arg1: i32) -> (i32, i32) {
    %c0_i32 = arith.constant 0 : i32
    %c0_i32_0 = arith.constant 0 : i32
    %c0_i32_1 = arith.constant 0 : i32
    return %c0_i32, %c0_i32_0 : i32, i32
  }
  func.func @transform_4(%arg0: i32, %arg1: i32) -> (i32, i32) {
    %c0_i32 = arith.constant 0 : i32
    %c0_i32_0 = arith.constant 0 : i32
    %c0_i32_1 = arith.constant 0 : i32
    return %c0_i32, %c0_i32_0 : i32, i32
  }
  func.func @transform_5(%arg0: i32, %arg1: i32) -> (i32, i32, i32) {
    %c0_i32 = arith.constant 0 : i32
    %c0_i32_0 = arith.constant 0 : i32
    %c0_i32_1 = arith.constant 0 : i32
    %c0_i32_2 = arith.constant 0 : i32
    return %c0_i32, %c0_i32_0, %c0_i32_1 : i32, i32, i32
  }
  func.func @transform_6(%arg0: i32, %arg1: i32) -> (i32, i32) {
    %c0_i32 = arith.constant 0 : i32
    %c0_i32_0 = arith.constant 0 : i32
    %c0_i32_1 = arith.constant 0 : i32
    return %c0_i32, %c0_i32_0 : i32, i32
  }
  func.func @transform_7(%arg0: i32, %arg1: i32) -> (i32, i32) {
    %c0_i32 = arith.constant 0 : i32
    %c0_i32_0 = arith.constant 0 : i32
    %c0_i32_1 = arith.constant 0 : i32
    return %c0_i32, %c0_i32_0 : i32, i32
  }
  func.func @transform_8(%arg0: i32, %arg1: i32) -> (i32, i32) {
    %c0_i32 = arith.constant 0 : i32
    %c0_i32_0 = arith.constant 0 : i32
    %c0_i32_1 = arith.constant 0 : i32
    return %c0_i32, %c0_i32_0 : i32, i32
  }
  func.func @transform_9(%arg0: i32, %arg1: i32) -> (i32, i32, i32) {
    %c0_i32 = arith.constant 0 : i32
    %c0_i32_0 = arith.constant 0 : i32
    return %arg0, %arg1, %c0_i32 : i32, i32, i32
  }
}

module attributes {stable_mosaic.version = 11 : i64} {
  func.func @ffn_kernel(%arg0: i32, %arg1: i32, %arg2: memref<1x1x76x128xbf16, #tpu.memory_space<vmem>>, %arg3: memref<1x1x72x128xf32, #tpu.memory_space<vmem>>, %arg4: memref<1x1x76x1xf32, #tpu.memory_space<vmem>>, %arg5: memref<128x128xbf16, #tpu.memory_space<vmem>>, %arg6: memref<1x128xf32, #tpu.memory_space<vmem>>, %arg7: memref<5x128x128xbf16, #tpu.memory_space<vmem>>, %arg8: memref<1x128xf32, #tpu.memory_space<vmem>>, %arg9: memref<1x128xf32, #tpu.memory_space<vmem>>, %arg10: memref<1x128xf32, #tpu.memory_space<vmem>>, %arg11: memref<1x72x128xf32, #tpu.memory_space<vmem>>) attributes {dimension_semantics = [#tpu.dimension_semantics<parallel>, #tpu.dimension_semantics<parallel>], iteration_bounds = array<i64: 2, 1>, scalar_prefetch = 0 : i64, scratch_operands = 0 : i64, tpu.core_type = #tpu.core_type<tc>, window_params = [{transform_indices = @transform_0, window_bounds = array<i64: 1, 1, 76, 128>}, {transform_indices = @transform_1, window_bounds = array<i64: 1, 1, 72, 128>}, {transform_indices = @transform_2, window_bounds = array<i64: 1, 1, 76, 1>}, {pipeline_mode = #tpu.pipeline_mode<synchronous>, transform_indices = @transform_3, window_bounds = array<i64: 128, 128>}, {pipeline_mode = #tpu.pipeline_mode<synchronous>, transform_indices = @transform_4, window_bounds = array<i64: 1, 128>}, {pipeline_mode = #tpu.pipeline_mode<synchronous>, transform_indices = @transform_5, window_bounds = array<i64: 5, 128, 128>}, {pipeline_mode = #tpu.pipeline_mode<synchronous>, transform_indices = @transform_6, window_bounds = array<i64: 1, 128>}, {pipeline_mode = #tpu.pipeline_mode<synchronous>, transform_indices = @transform_7, window_bounds = array<i64: 1, 128>}, {pipeline_mode = #tpu.pipeline_mode<synchronous>, transform_indices = @transform_8, window_bounds = array<i64: 1, 128>}, {transform_indices = @transform_9, window_bounds = array<i64: 1, 72, 128>}]} {
    %c0 = arith.constant 0 : index
    %c0_0 = arith.constant 0 : index
    %c0_1 = arith.constant 0 : index
    %c0_2 = arith.constant 0 : index
    %0 = vector.load %arg4[%c0, %c0_0, %c0_1, %c0_2] : memref<1x1x76x1xf32, #tpu.memory_space<vmem>>, vector<1x1x76x1xf32>
    %1 = vector.shape_cast %0 : vector<1x1x76x1xf32> to vector<76x1xf32>
    %c0_3 = arith.constant 0 : index
    %c0_4 = arith.constant 0 : index
    %c0_5 = arith.constant 0 : index
    %c0_6 = arith.constant 0 : index
    %2 = vector.load %arg2[%c0_3, %c0_4, %c0_5, %c0_6] : memref<1x1x76x128xbf16, #tpu.memory_space<vmem>>, vector<1x1x76x128xbf16>
    %3 = vector.shape_cast %2 : vector<1x1x76x128xbf16> to vector<76x128xbf16>
    %c0_7 = arith.constant 0 : index
    %c0_8 = arith.constant 0 : index
    %4 = vector.load %arg5[%c0_7, %c0_8] : memref<128x128xbf16, #tpu.memory_space<vmem>>, vector<128x128xbf16>
    %cst = arith.constant dense<0.000000e+00> : vector<76x128xf32>
    %5 = tpu.matmul %3, %4, %cst {dimension_numbers = #tpu.dot_dimension_numbers<[1], [0], [0], [1], [0, 0, 1, 1], [], []>} : vector<76x128xbf16>, vector<128x128xbf16>, vector<76x128xf32> -> vector<76x128xf32>
    %c0_9 = arith.constant 0 : index
    %c0_10 = arith.constant 0 : index
    %6 = vector.load %arg6[%c0_9, %c0_10] : memref<1x128xf32, #tpu.memory_space<vmem>>, vector<1x128xf32>
    %7 = vector.broadcast %6 : vector<1x128xf32> to vector<76x128xf32>
    %8 = arith.addf %5, %7 : vector<76x128xf32>
    %cst_11 = arith.constant 0.000000e+00 : f32
    %9 = vector.broadcast %cst_11 : f32 to vector<76x128xf32>
    %10 = arith.maximumf %8, %9 : vector<76x128xf32>
    %11 = vector.broadcast %1 : vector<76x1xf32> to vector<76x128xf32>
    %12 = arith.mulf %10, %11 : vector<76x128xf32>
    %13 = arith.truncf %12 : vector<76x128xf32> to vector<76x128xbf16>
    %14 = vector.extract_strided_slice %13 {offsets = [0, 0], sizes = [72, 128], strides = [1, 1]} : vector<76x128xbf16> to vector<72x128xbf16>
    %c0_12 = arith.constant 0 : index
    %c0_13 = arith.constant 0 : index
    %c0_14 = arith.constant 0 : index
    %15 = vector.load %arg7[%c0_12, %c0_13, %c0_14] : memref<5x128x128xbf16, #tpu.memory_space<vmem>>, vector<1x128x128xbf16>
    %16 = vector.shape_cast %15 : vector<1x128x128xbf16> to vector<128x128xbf16>
    %cst_15 = arith.constant dense<0.000000e+00> : vector<72x128xf32>
    %17 = tpu.matmul %14, %16, %cst_15 {dimension_numbers = #tpu.dot_dimension_numbers<[1], [0], [0], [1], [0, 0, 1, 1], [], []>} : vector<72x128xbf16>, vector<128x128xbf16>, vector<72x128xf32> -> vector<72x128xf32>
    %18 = vector.extract_strided_slice %13 {offsets = [1, 0], sizes = [72, 128], strides = [1, 1]} : vector<76x128xbf16> to vector<72x128xbf16>
    %c1 = arith.constant 1 : index
    %c0_16 = arith.constant 0 : index
    %c0_17 = arith.constant 0 : index
    %19 = vector.load %arg7[%c1, %c0_16, %c0_17] : memref<5x128x128xbf16, #tpu.memory_space<vmem>>, vector<1x128x128xbf16>
    %20 = vector.shape_cast %19 : vector<1x128x128xbf16> to vector<128x128xbf16>
    %cst_18 = arith.constant dense<0.000000e+00> : vector<72x128xf32>
    %21 = tpu.matmul %18, %20, %cst_18 {dimension_numbers = #tpu.dot_dimension_numbers<[1], [0], [0], [1], [0, 0, 1, 1], [], []>} : vector<72x128xbf16>, vector<128x128xbf16>, vector<72x128xf32> -> vector<72x128xf32>
    %22 = arith.addf %17, %21 : vector<72x128xf32>
    %23 = vector.extract_strided_slice %13 {offsets = [2, 0], sizes = [72, 128], strides = [1, 1]} : vector<76x128xbf16> to vector<72x128xbf16>
    %c2 = arith.constant 2 : index
    %c0_19 = arith.constant 0 : index
    %c0_20 = arith.constant 0 : index
    %24 = vector.load %arg7[%c2, %c0_19, %c0_20] : memref<5x128x128xbf16, #tpu.memory_space<vmem>>, vector<1x128x128xbf16>
    %25 = vector.shape_cast %24 : vector<1x128x128xbf16> to vector<128x128xbf16>
    %cst_21 = arith.constant dense<0.000000e+00> : vector<72x128xf32>
    %26 = tpu.matmul %23, %25, %cst_21 {dimension_numbers = #tpu.dot_dimension_numbers<[1], [0], [0], [1], [0, 0, 1, 1], [], []>} : vector<72x128xbf16>, vector<128x128xbf16>, vector<72x128xf32> -> vector<72x128xf32>
    %27 = arith.addf %22, %26 : vector<72x128xf32>
    %28 = vector.extract_strided_slice %13 {offsets = [3, 0], sizes = [72, 128], strides = [1, 1]} : vector<76x128xbf16> to vector<72x128xbf16>
    %c3 = arith.constant 3 : index
    %c0_22 = arith.constant 0 : index
    %c0_23 = arith.constant 0 : index
    %29 = vector.load %arg7[%c3, %c0_22, %c0_23] : memref<5x128x128xbf16, #tpu.memory_space<vmem>>, vector<1x128x128xbf16>
    %30 = vector.shape_cast %29 : vector<1x128x128xbf16> to vector<128x128xbf16>
    %cst_24 = arith.constant dense<0.000000e+00> : vector<72x128xf32>
    %31 = tpu.matmul %28, %30, %cst_24 {dimension_numbers = #tpu.dot_dimension_numbers<[1], [0], [0], [1], [0, 0, 1, 1], [], []>} : vector<72x128xbf16>, vector<128x128xbf16>, vector<72x128xf32> -> vector<72x128xf32>
    %32 = arith.addf %27, %31 : vector<72x128xf32>
    %33 = vector.extract_strided_slice %13 {offsets = [4, 0], sizes = [72, 128], strides = [1, 1]} : vector<76x128xbf16> to vector<72x128xbf16>
    %c4 = arith.constant 4 : index
    %c0_25 = arith.constant 0 : index
    %c0_26 = arith.constant 0 : index
    %34 = vector.load %arg7[%c4, %c0_25, %c0_26] : memref<5x128x128xbf16, #tpu.memory_space<vmem>>, vector<1x128x128xbf16>
    %35 = vector.shape_cast %34 : vector<1x128x128xbf16> to vector<128x128xbf16>
    %cst_27 = arith.constant dense<0.000000e+00> : vector<72x128xf32>
    %36 = tpu.matmul %33, %35, %cst_27 {dimension_numbers = #tpu.dot_dimension_numbers<[1], [0], [0], [1], [0, 0, 1, 1], [], []>} : vector<72x128xbf16>, vector<128x128xbf16>, vector<72x128xf32> -> vector<72x128xf32>
    %37 = arith.addf %32, %36 : vector<72x128xf32>
    %c0_28 = arith.constant 0 : index
    %c0_29 = arith.constant 0 : index
    %38 = vector.load %arg8[%c0_28, %c0_29] : memref<1x128xf32, #tpu.memory_space<vmem>>, vector<1x128xf32>
    %39 = vector.broadcast %38 : vector<1x128xf32> to vector<72x128xf32>
    %40 = arith.addf %37, %39 : vector<72x128xf32>
    %c0_30 = arith.constant 0 : index
    %c0_31 = arith.constant 0 : index
    %c0_32 = arith.constant 0 : index
    %c0_33 = arith.constant 0 : index
    %41 = vector.load %arg3[%c0_30, %c0_31, %c0_32, %c0_33] : memref<1x1x72x128xf32, #tpu.memory_space<vmem>>, vector<1x1x72x128xf32>
    %42 = vector.shape_cast %41 : vector<1x1x72x128xf32> to vector<72x128xf32>
    %43 = arith.addf %40, %42 : vector<72x128xf32>
    %cst_34 = arith.constant dense<0.000000e+00> : vector<72xf32>
    %44 = vector.multi_reduction <add>, %43, %cst_34 [1] : vector<72x128xf32> to vector<72xf32>
    %45 = vector.shape_cast %44 : vector<72xf32> to vector<72x1xf32>
    %cst_35 = arith.constant 6.250000e-02 : f32
    %46 = vector.broadcast %cst_35 : f32 to vector<72x1xf32>
    %47 = arith.mulf %45, %46 : vector<72x1xf32>
    %48 = vector.broadcast %47 : vector<72x1xf32> to vector<72x128xf32>
    %49 = arith.subf %43, %48 : vector<72x128xf32>
    %50 = tpu.iota {dimensions = array<i32: 1>} : vector<1x128xi32>
    %c16_i32 = arith.constant 16 : i32
    %51 = vector.broadcast %c16_i32 : i32 to vector<1x128xi32>
    %52 = arith.cmpi slt, %50, %51 : vector<1x128xi32>
    %53 = arith.extui %52 : vector<1x128xi1> to vector<1x128xi32>
    %54 = arith.sitofp %53 : vector<1x128xi32> to vector<1x128xf32>
    %55 = vector.broadcast %54 : vector<1x128xf32> to vector<72x128xf32>
    %56 = arith.mulf %49, %55 : vector<72x128xf32>
    %57 = arith.mulf %56, %56 : vector<72x128xf32>
    %cst_36 = arith.constant dense<0.000000e+00> : vector<72xf32>
    %58 = vector.multi_reduction <add>, %57, %cst_36 [1] : vector<72x128xf32> to vector<72xf32>
    %59 = vector.shape_cast %58 : vector<72xf32> to vector<72x1xf32>
    %cst_37 = arith.constant 6.250000e-02 : f32
    %60 = vector.broadcast %cst_37 : f32 to vector<72x1xf32>
    %61 = arith.mulf %59, %60 : vector<72x1xf32>
    %cst_38 = arith.constant 9.99999974E-6 : f32
    %62 = vector.broadcast %cst_38 : f32 to vector<72x1xf32>
    %63 = arith.addf %61, %62 : vector<72x1xf32>
    %64 = math.rsqrt %63 : vector<72x1xf32>
    %65 = vector.broadcast %64 : vector<72x1xf32> to vector<72x128xf32>
    %66 = arith.mulf %56, %65 : vector<72x128xf32>
    %c0_39 = arith.constant 0 : index
    %c0_40 = arith.constant 0 : index
    %67 = vector.load %arg9[%c0_39, %c0_40] : memref<1x128xf32, #tpu.memory_space<vmem>>, vector<1x128xf32>
    %68 = vector.broadcast %67 : vector<1x128xf32> to vector<72x128xf32>
    %69 = arith.mulf %66, %68 : vector<72x128xf32>
    %c0_41 = arith.constant 0 : index
    %c0_42 = arith.constant 0 : index
    %70 = vector.load %arg10[%c0_41, %c0_42] : memref<1x128xf32, #tpu.memory_space<vmem>>, vector<1x128xf32>
    %71 = vector.broadcast %70 : vector<1x128xf32> to vector<72x128xf32>
    %72 = arith.addf %69, %71 : vector<72x128xf32>
    %73 = vector.extract_strided_slice %1 {offsets = [2, 0], sizes = [72, 1], strides = [1, 1]} : vector<76x1xf32> to vector<72x1xf32>
    %74 = vector.broadcast %73 : vector<72x1xf32> to vector<72x128xf32>
    %75 = arith.mulf %72, %74 : vector<72x128xf32>
    %c0_43 = arith.constant 0 : index
    %c0_44 = arith.constant 0 : index
    %c0_45 = arith.constant 0 : index
    %76 = vector.load %arg11[%c0_43, %c0_44, %c0_45] : memref<1x72x128xf32, #tpu.memory_space<vmem>>, vector<1x72x128xf32>
    %77 = vector.shape_cast %76 : vector<1x72x128xf32> to vector<72x128xf32>
    %78 = vector.shape_cast %75 : vector<72x128xf32> to vector<1x72x128xf32>
    tpu.vector_store %arg11[%c0_43, %c0_44, %c0_45], %78 {strides = array<i32>} : memref<1x72x128xf32, #tpu.memory_space<vmem>>, vector<1x72x128xf32>,
    return
  }
  func.func @transform_0(%arg0: i32, %arg1: i32) -> (i32, i32, i32, i32) {
    %c0_i32 = arith.constant 0 : i32
    %c0_i32_0 = arith.constant 0 : i32
    %c0_i32_1 = arith.constant 0 : i32
    return %arg0, %arg1, %c0_i32, %c0_i32_0 : i32, i32, i32, i32
  }
  func.func @transform_1(%arg0: i32, %arg1: i32) -> (i32, i32, i32, i32) {
    %c0_i32 = arith.constant 0 : i32
    %c0_i32_0 = arith.constant 0 : i32
    %c0_i32_1 = arith.constant 0 : i32
    return %arg0, %arg1, %c0_i32, %c0_i32_0 : i32, i32, i32, i32
  }
  func.func @transform_2(%arg0: i32, %arg1: i32) -> (i32, i32, i32, i32) {
    %c0_i32 = arith.constant 0 : i32
    %c0_i32_0 = arith.constant 0 : i32
    %c0_i32_1 = arith.constant 0 : i32
    return %arg0, %arg1, %c0_i32, %c0_i32_0 : i32, i32, i32, i32
  }
  func.func @transform_3(%arg0: i32, %arg1: i32) -> (i32, i32) {
    %c0_i32 = arith.constant 0 : i32
    %c0_i32_0 = arith.constant 0 : i32
    %c0_i32_1 = arith.constant 0 : i32
    return %c0_i32, %c0_i32_0 : i32, i32
  }
  func.func @transform_4(%arg0: i32, %arg1: i32) -> (i32, i32) {
    %c0_i32 = arith.constant 0 : i32
    %c0_i32_0 = arith.constant 0 : i32
    %c0_i32_1 = arith.constant 0 : i32
    return %c0_i32, %c0_i32_0 : i32, i32
  }
  func.func @transform_5(%arg0: i32, %arg1: i32) -> (i32, i32, i32) {
    %c0_i32 = arith.constant 0 : i32
    %c0_i32_0 = arith.constant 0 : i32
    %c0_i32_1 = arith.constant 0 : i32
    %c0_i32_2 = arith.constant 0 : i32
    return %c0_i32, %c0_i32_0, %c0_i32_1 : i32, i32, i32
  }
  func.func @transform_6(%arg0: i32, %arg1: i32) -> (i32, i32) {
    %c0_i32 = arith.constant 0 : i32
    %c0_i32_0 = arith.constant 0 : i32
    %c0_i32_1 = arith.constant 0 : i32
    return %c0_i32, %c0_i32_0 : i32, i32
  }
  func.func @transform_7(%arg0: i32, %arg1: i32) -> (i32, i32) {
    %c0_i32 = arith.constant 0 : i32
    %c0_i32_0 = arith.constant 0 : i32
    %c0_i32_1 = arith.constant 0 : i32
    return %c0_i32, %c0_i32_0 : i32, i32
  }
  func.func @transform_8(%arg0: i32, %arg1: i32) -> (i32, i32) {
    %c0_i32 = arith.constant 0 : i32
    %c0_i32_0 = arith.constant 0 : i32
    %c0_i32_1 = arith.constant 0 : i32
    return %c0_i32, %c0_i32_0 : i32, i32
  }
  func.func @transform_9(%arg0: i32, %arg1: i32) -> (i32, i32, i32) {
    %c0_i32 = arith.constant 0 : i32
    %c0_i32_0 = arith.constant 0 : i32
    return %arg0, %arg1, %c0_i32 : i32, i32, i32
  }
}

</mosaic_0001>

<bundles_post_ra>
// kernel: tpu_custom_call.1
= control target key start
LH: loop header
LB: loop body
LE: loop exit
PB: predicated region body
PF: predicated region fallthrough
CT: control target
= control target key end

     0   :  { %14 = vsyncpa [#allocation3], 0  ;;  %s2795_s0 = inlined_call_operand.vmem [shape: bf16[2,1,76,128], index: 0, kind: input, shape index: {}]   ;;  %s2796_s1 = inlined_call_operand.vmem [shape: f32[2,1,72,128], index: 1, kind: input, shape index: {}]   ;;  %s2797_s2 = inlined_call_operand.vmem [shape: f32[2,1,76,1], index: 2, kind: input, shape index: {}]   ;;  %s2798_s3 = inlined_call_operand.vmem [shape: bf16[128,128], index: 3, kind: input, shape index: {}]   ;;  %s2799_s4 = inlined_call_operand.vmem [shape: f32[1,128], index: 4, kind: input, shape index: {}]   ;;  %s2800_s5 = inlined_call_operand.hbm [shape: bf16[5,128,128], index: 5, kind: input, shape index: {}]   ;;  %s2801_s6 = inlined_call_operand.vmem [shape: f32[1,128], index: 6, kind: input, shape index: {}]   ;;  %s2802_s7 = inlined_call_operand.vmem [shape: f32[1,128], index: 7, kind: input, shape index: {}]   ;;  %s2803_s8 = inlined_call_operand.vmem [shape: f32[1,128], index: 8, kind: input, shape index: {}]   ;;  %s2804_s9 = inlined_call_operand.hbm [shape: f32[2,72,128], index: 9, kind: output, shape index: {}]  }
   0x1   :  { %15 = vsyncpa [#allocation4], 0 }
   0x2   :  { %17 = vsyncpa [#allocation4 + $0x1], 0  ;;  %s2344_s30 = smov 0   ;;  %s2346_s10 = smov 0  }
   0x3   :  { %s2348_s11 = smov 0   ;;  %s2350_s12 = smov 0  }
   0x4   :  { %s2352_s13 = smov 0   ;;  %s2354_s14 = smov 0  }
   0x5 LB: > { %s1776_s15 = sadd.s32 4294967295, %s2285_s14   ;;  %s1777_s16 = sadd.s32 4294967294, %s2285_s14   ;;  %s2285_s14 = sphi %s2354_s14, %s23_s14   ;;  %s2281_s13 = sphi %s2352_s13, %s2811_s13   ;;  %s2277_s12 = sphi %s2350_s12, %s2810_s12   ;;  %s2273_s11 = sphi %s2348_s11, %s2809_s11   ;;  %s2269_s10 = sphi %s2346_s10, %s2808_s10   ;;  %s2265_s30 = sphi %s2344_s30, %s2807_s30  }
   0x6   : > { %s35_s17 = sadd.s32 1, %s2281_s13  ;;  %s254_s18 = sadd.s32 1, %s2273_s11 }
   0x7   : > { %p37_p0 = scmp.ge.s32.totalorder %s35_s17, 2  ;;  %p264_p1 = scmp.ne.s32.totalorder %s2273_s11, %s2269_s10 }
   0x8   : > { %p265_p2 = scmp.eq.s32.totalorder %s1776_s15, 1  ;;  %p270_p3 = scmp.ne.s32.totalorder %s2269_s10, %s2265_s30 }
   0x9   : > { %s2813_s17 = smov (%p37_p0, %s35_s17), 0  ;;  %p271_p5 = scmp.eq.s32.totalorder %s1777_s16, 1 }
   0xa   : > { %p2384_p4 = por %p265_p2, %p264_p1  ;;  %s249_s20 = ssub.s32 %s2281_s13, %s2813_s17 }
   0xb   : > { %p1778_p6 = scmp.ge.s32.totalorder %s2285_s14, 1  ;;  %p252_p7 = scmp.eq.s32.totalorder %s249_s20, 0 }
   0xc   : > { %p2391_p8 = por %p271_p5, %p270_p3  ;;  %p278_p9 = scmp.lt.s32.totalorder %s2285_s14, 3 }
   0xd   : > { %s2397_s22 = scalar_select %p252_p7, %s2273_s11, %s254_s18  }
   0xe   : > { %p279_p10 = pnand %p1778_p6, %p278_p9  ;;  %p2090_p11 = scmp.eq.s32.totalorder %s1776_s15, 0 }
   0xf   : > { %s295_s25 = sshll.u32 %s2800_s5, 4  ;;  %s2287_s26 = smov [#allocation2]   ;;  %s296_s25 = int_to_ptr.hbm [resolvable:$true] %s295_s25 }
  0x10   : > { %p2082_p12 = pneg %p279_p10  ;;  %s297_s27 = sshll.u32 %s2287_s26, 4  ;;  %s298_s27 = int_to_ptr.vmem [resolvable:$true] %s297_s27 }
  0x11   : > { %s2288_s28 = smov 64   ;;  %s2289_s29 = smov 4  }
  0x12   : > { %p2083_p13 = pnand %p2090_p11, %p2082_p12  ;;  %358 = sbr.rel (%p279_p10) target bundleno = 757 (0x2f5), region = 56 }
  0x14   : > { %2085 = dma.hbm_to_vmem [thread:$0]  (!%p2083_p13), %s296_s25, 5120, %s298_s27, [#allocation3], %s2288_s28, %s2288_s28, %s2289_s29  }
  0x17   : > { %2256 = dma.done.wait (%p2090_p11), [#allocation3], 5120  }
  0x18   : > { %2258 = vsyncadd (%p2090_p11), [#allocation3], 4294962176  ;;  %p417_p0 = scmp.lt.s32.totalorder %s2277_s12, 1  ;;  %v2014_v0 = vld [vmem:[%s2798_s3 + $0x38] sm:$0xff]  ;;  %v2013_v1 = vld [vmem:[%s2798_s3 + $0x30] sm:$0xff]  ;;  %v2290_v2 = vmov 0  }
  0x19   : > { %563 = vmatpush.bf16.msra.mxu0 %v2014_v0  ;;  %2055 = vmatpush.bf16.msra.mxu2 %v2014_v0  ;;  %v2012_v5 = vld [vmem:[%s2798_s3 + $0x28] sm:$0xff]  ;;  %v2011_v8 = vld [vmem:[%s2798_s3 + $0x20] sm:$0xff]  ;;  %v2010_v9 = vld [vmem:[%s2798_s3 + $0x18] sm:$0xff]  ;;  %vm1219_vm0 = vcmask 1045504   ;;  %vm735_vm1 = vsmask.f32 7424 }
  0x1a   : > { %s2404_s15 = scalar_select %p417_p0, %s2277_s12, 1  ;;  %2149 = vset.pattern.permute.xlu1 %v2290_v2  ;;  %2148 = vset.pattern.permute.xlu0 %v2290_v2  ;;  %v2009_v12 = vld [vmem:[%s2798_s3 + $0x10] sm:$0xff]  ;;  %v2008_v13 = vld [vmem:[%s2798_s3 + $0x8] sm:$0xff]  ;;  %v2007_v14 = vld [vmem:[%s2798_s3] sm:$0xff]  ;;  %vm1087_vm2 = vsmask.f32 6400 }
  0x1b   : > { %2150 = vset.pattern.permute.xlu2 %v2290_v2  ;;  %v2022_v19 = vld [vmem:[#allocation2 + $0x38] sm:$0xff]  ;;  %v2021_v20 = vld [vmem:[#allocation2 + $0x30] sm:$0xff]  ;;  %v2020_v28 = vld [vmem:[#allocation2 + $0x28] sm:$0xff]  ;;  %vm965_vm3 = vcmask 1046528  }
  0x1c   : > { %s2074_s16 = smul.u32 80, %s2404_s15  ;;  %v2019_v30 = vld [vmem:[#allocation2 + $0x20] sm:$0xff]  ;;  %v2018_v35 = vld [vmem:[#allocation2 + $0x18] sm:$0xff]  ;;  %v2017_v37 = vld [vmem:[#allocation2 + $0x10] sm:$0xff] }
  0x1d   : > { %564 = vmatpush.bf16.msra.mxu0 %v2013_v1  ;;  %2056 = vmatpush.bf16.msra.mxu2 %v2013_v1  ;;  %s2072_s29 = smul.u32 40, %s2404_s15  ;;  %v2030_v38 = vld [vmem:[#allocation2 + $0x78] sm:$0xff]  ;;  %v2016_v41 = vld [vmem:[#allocation2 + $0x8] sm:$0xff]  ;;  %v2029_v43 = vld [vmem:[#allocation2 + $0x70] sm:$0xff] }
  0x1e   : > { %s2413_s26 = scalar_lea.vmem %s2797_s2, %s2074_s16  ;;  %828 = vmatpush.bf16.msra.mxu1 %v2030_v38  ;;  %v2046_v39 = vld [vmem:[#allocation2 + $0xf8] sm:$0xff]  ;;  %2063 = vmatpush.bf16.msra.mxu3 %v2030_v38  ;;  %v2045_v46 = vld [vmem:[#allocation2 + $0xf0] sm:$0xff]  ;;  %v2015_v47 = vld [vmem:[#allocation2] sm:$0xff]  ;;  %s2073_s27 = smul.u32 72, %s2404_s15 }
  0x1f   : > { %v451_v3 = vld [vmem:[%s2413_s26 + $0x30] sm:$0xff]  ;;  %v449_v4 = vld [vmem:[%s2413_s26 + $0x20] sm:$0xff]  ;;  %v452_v6 = vld [vmem:[%s2413_s26 + $0x38] sm:$0xff]  ;;  %s425_s24 = scalar_lea.vmem %s2795_s0, %s2072_s29  ;;  %s414_s15 = sand.u32 1, %s2269_s10  }
  0x20   : > { %639 = vperm.xlu1 %2149, %v451_v3   ;;  %629 = vperm.xlu0 %2148, %v449_v4   ;;  %v450_v7 = vld [vmem:[%s2413_s26 + $0x28] sm:$0xff]  ;;  %v445_v11 = vld [vmem:[%s2413_s26] sm:$0xff]  ;;  %v2004_v16 = vld [vmem:[%s425_s24 + $0x10] sm:$0xff]  ;;  %s2588_s16 = scalar_lea.vmem %s2796_s1, %s2073_s27  ;;  %s2071_s27 = smul.u32 72, %s414_s15 }
  0x21   : > { %565 = vmatpush.bf16.msra.mxu0 %v2012_v5  ;;  %2057 = vmatpush.bf16.msra.mxu2 %v2012_v5  ;;  %v446_v10 = vld [vmem:[%s2413_s26 + $0x8] sm:$0xff]  ;;  %v2002_v15 = vld [vmem:[%s425_s24] sm:$0xff]  ;;  %v448_v17 = vld [vmem:[%s2413_s26 + $0x18] sm:$0xff]  ;;  %s2075_s29 = smul.u32 72, %s2277_s12 }
  0x22   : > { %v453_v18 = vld [vmem:[%s2413_s26 + $0x40] sm:$0xff]  ;;  %v454_v21 = vld [vmem:[%s2413_s26 + $0x48] sm:$0xf]  ;;  %v2005_v23 = vld [vmem:[%s425_s24 + $0x18] sm:$0xff]  ;;  %829 = vmatpush.bf16.msra.mxu1 %v2029_v43  ;;  %2064 = vmatpush.bf16.msra.mxu3 %v2029_v43  ;;  %s2704_s28 = scalar_lea.vmem [#allocation5], %s2071_s27 }
  0x23   : > { %649 = vperm.xlu2 %2150, %v453_v18   ;;  %v2003_v22 = vld [vmem:[%s425_s24 + $0x8] sm:$0xff]  ;;  %v447_v24 = vld [vmem:[%s2413_s26 + $0x10] sm:$0xff]  ;;  %v1804_v25 = vld [vmem:[%s425_s24 + $0x20] sm:$0xf]  ;;  %s1636_s20 = scalar_lea.hbm %s2804_s9, %s2075_s29  ;;  %s1637_s23 = sshll.u32 %s2704_s28, 4  ;;  %s1638_s23 = int_to_ptr.vmem [resolvable:$true] %s1637_s23 }
  0x24   : > { %v2006_v26 = vld [vmem:[%s425_s24 + $0x20] sm:$0x30]  ;;  %v2028_v49 = vld [vmem:[#allocation2 + $0x68] sm:$0xff]  ;;  %v2026_v55 = vld [vmem:[#allocation2 + $0x58] sm:$0xff]  ;;  %s1639_s12 = sshll.u32 %s1636_s20, 4  ;;  %s1623_s24 = scalar_lea.sflag [#allocation4], %s414_s15  ;;  %s1640_s12 = int_to_ptr.hbm [resolvable:$true] %s1639_s12 }
  0x25   : > { %566 = vmatpush.bf16.msra.mxu0 %v2011_v8  ;;  %2058 = vmatpush.bf16.msra.mxu2 %v2011_v8  ;;  %v1805_v27 = vor.u32 %v2006_v26, %v1804_v25  ;;  %v2044_v50 = vld [vmem:[#allocation2 + $0xe8] sm:$0xff]  ;;  %v2027_v51 = vld [vmem:[#allocation2 + $0x60] sm:$0xff]  ;;  %v2042_v57 = vld [vmem:[#allocation2 + $0xd8] sm:$0xff]  ;;  %s2217_s26 = sshra.s32 %s1640_s12, 4  ;;  %s2218_s26 = int_to_ptr.hbm [resolvable:$true] %s2217_s26 }
  0x26   : > { %830 = vmatpush.bf16.msra.mxu1 %v2028_v49  ;;  %2065 = vmatpush.bf16.msra.mxu3 %v2028_v49  ;;  %v2043_v52 = vld [vmem:[#allocation2 + $0xe0] sm:$0xff]  ;;  %v2025_v58 = vld [vmem:[#allocation2 + $0x50] sm:$0xff]  ;;  %v2024_v63 = vld [vmem:[#allocation2 + $0x48] sm:$0xff]  ;;  %s2219_s25 = scalar_lea.hbm %s2218_s26, 72  ;;  %p2224_p5 = scmp.lt.s32.totalorder %s2218_s26, %s2804_s9 }
  0x27   : > { %v2485_v59 = vld [vmem:[%s2799_s4] ss:$0 sm:$0xff]  ;;  %v2041_v60 = vld [vmem:[#allocation2 + $0xd0] sm:$0xff]  ;;  %v2040_v1 = vld [vmem:[#allocation2 + $0xc8] sm:$0xff]  ;;  %p2220_p1 = scmp.ne.s32.totalorder %s2218_s26, %s2219_s25 }
  0x28   : > { %644 = vperm.xlu1 %2149, %v452_v6   ;;  %634 = vperm.xlu0 %2148, %v450_v7   ;;  %v2023_v3 = vld [vmem:[#allocation2 + $0x40] sm:$0xff] }
  0x29   : > { %567 = vmatpush.bf16.msra.mxu0 %v2010_v9  ;;  %2059 = vmatpush.bf16.msra.mxu2 %v2010_v9  ;;  %v2039_v6 = vld [vmem:[#allocation2 + $0xc0] sm:$0xff]  ;;  %v2054_v9 = vld [vmem:[#allocation2 + $0x138] sm:$0xff]  ;;  %p2221_p2 = pnand %p2220_p1, %p2384_p4 }
  0x2a   : > { %831 = vmatpush.bf16.msra.mxu1 %v2027_v51  ;;  %2066 = vmatpush.bf16.msra.mxu3 %v2027_v51 }
  0x2b   : > { %654 = vperm.xlu2 %2150, %v454_v21   ;;  %p2222_p3 = pneg %p2221_p2 }
  0x2d   : > { %568 = vmatpush.bf16.msra.mxu0 %v2009_v12  ;;  %2060 = vmatpush.bf16.msra.mxu2 %v2009_v12 }
  0x2e   : > { %832 = vmatpush.bf16.msra.mxu1 %v2026_v55  ;;  %2067 = vmatpush.bf16.msra.mxu3 %v2026_v55  ;;  %v2037_v55 = vld [vmem:[#allocation2 + $0xb0] sm:$0xff] }
  0x30   : > { %614 = vperm.xlu1 %2149, %v446_v10   ;;  %609 = vperm.xlu0 %2148, %v445_v11  }
  0x31   : > { %569 = vmatpush.bf16.msra.mxu0 %v2008_v13  ;;  %2061 = vmatpush.bf16.msra.mxu2 %v2008_v13 }
  0x32   : > { %833 = vmatpush.bf16.msra.mxu1 %v2025_v58  ;;  %2068 = vmatpush.bf16.msra.mxu3 %v2025_v58 }
  0x33   : > { %619 = vperm.xlu2 %2150, %v447_v24   ;;  %v2052_v24 = vld [vmem:[#allocation2 + $0x128] sm:$0xff] }
  0x35   : > { %570 = vmatpush.bf16.msra.mxu0 %v2007_v14  ;;  %2062 = vmatpush.bf16.msra.mxu2 %v2007_v14 }
  0x36   : > { %834 = vmatpush.bf16.msra.mxu1 %v2024_v63  ;;  %2069 = vmatpush.bf16.msra.mxu3 %v2024_v63 }
  0x38   : > { %571 = vmatmul.bf16.vlgmr.msra.gmra.mxu0 %v2002_v15  ;;  %581 = vmatmul.bf16.vlgmr.msra.gmra.mxu2 %v2004_v16  ;;  %v2053_v15 = vld [vmem:[#allocation2 + $0x130] sm:$0xff] }
  0x39   : > { %624 = vperm.xlu0 %2148, %v448_v17   ;;  %915 = vmatpush.bf16.msrb.mxu2 %v2022_v19 }
  0x3a   : > { %1160 = vmatpush.bf16.msrb.mxu0 %v2046_v39  ;;  %835 = vmatpush.bf16.msra.mxu1 %v2023_v3 }
  0x3b   : > { %2070 = vmatpush.bf16.msra.mxu3 %v2023_v3 }
  0x3d   : > { %916 = vmatpush.bf16.msrb.mxu2 %v2021_v20 }
  0x3e   : > { %1161 = vmatpush.bf16.msrb.mxu0 %v2045_v46  ;;  %1282 = vmatpush.bf16.msrb.mxu1 %v2054_v9 }
  0x41   : > { %917 = vmatpush.bf16.msrb.mxu2 %v2020_v28 }
  0x42   : > { %1162 = vmatpush.bf16.msrb.mxu0 %v2044_v50  ;;  %1283 = vmatpush.bf16.msrb.mxu1 %v2053_v15  ;;  %v2050_v50 = vld [vmem:[#allocation2 + $0x118] sm:$0xff] }
  0x45   : > { %918 = vmatpush.bf16.msrb.mxu2 %v2019_v30 }
  0x46   : > { %1163 = vmatpush.bf16.msrb.mxu0 %v2043_v52  ;;  %1284 = vmatpush.bf16.msrb.mxu1 %v2052_v24 }
  0x48   : > { %576 = vmatmul.bf16.gmra.mxu0 %v2003_v22  ;;  %586 = vmatmul.bf16.gmra.mxu2 %v2005_v23 }
  0x49   : > { %919 = vmatpush.bf16.msrb.mxu2 %v2018_v35 }
  0x4a   : > { %1164 = vmatpush.bf16.msrb.mxu0 %v2042_v57 }
  0x4d   : > { %920 = vmatpush.bf16.msrb.mxu2 %v2017_v37  ;;  %v2051_v37 = vld [vmem:[#allocation2 + $0x120] sm:$0xff] }
  0x4e   : > { %1165 = vmatpush.bf16.msrb.mxu0 %v2041_v60  ;;  %1285 = vmatpush.bf16.msrb.mxu1 %v2051_v37 }
  0x51   : > { %921 = vmatpush.bf16.msrb.mxu2 %v2016_v41 }
  0x52   : > { %1166 = vmatpush.bf16.msrb.mxu0 %v2040_v1  ;;  %1286 = vmatpush.bf16.msrb.mxu1 %v2050_v50 }
  0x55   : > { %922 = vmatpush.bf16.msrb.mxu2 %v2015_v47  ;;  %v2038_v47 = vld [vmem:[#allocation2 + $0xb8] sm:$0xff] }
  0x56   : > { %1167 = vmatpush.bf16.msrb.mxu0 %v2039_v6  ;;  %1028 = vmatpush.bf16.msrb.mxu3 %v2038_v47  ;;  %v2036_v6 = vld [vmem:[#allocation2 + $0xa8] sm:$0xff] }
  0x58   : > { %591 = vmatmul.bf16.gmra.mxu2 %v1805_v27 }
  0x5a   : > { %1029 = vmatpush.bf16.msrb.mxu3 %v2037_v55 }
  0x5e   : > { %1030 = vmatpush.bf16.msrb.mxu3 %v2036_v6  ;;  %v2032_v6 = vld [vmem:[#allocation2 + $0x88] sm:$0xff] }
  0x7d   : > { %v2468_v44 = vpop.permute.xlu2 %649 }
  0x7e   : > { %v1591_v45 = vrot.slane %v2468_v44, 2 }
  0x85   : > { %v2476_v53 = vpop.permute.xlu2 %654 }
  0x86   : > { %v1593_v54 = vrot.slane %v2476_v53, 2 }
  0x88   : > { %v2480_v56 = vsel %vm1219_vm0, %v1591_v45, %v1593_v54 }
  0x8d   : > { %v2502_v35 = vpop.permute.xlu2 %619 }
  0x92   : > { %v2450_v29 = vpop.permute.xlu0 %629  ;;  %v2452_v31 = vpop.permute.xlu1 %639 }
  0x93   : > { %v1583_v32 = vrot.slane %v2450_v29, 2 }
  0x9a   : > { %v2455_v33 = vpop.permute.xlu0 %634  ;;  %v2465_v40 = vpop.permute.xlu1 %644 }
  0x9b   : > { %v1585_v34 = vrot.slane %v2455_v33, 2  ;;  %v1589_v42 = vrot.slane %v2465_v40, 2 }
  0x9d   : > { %v2463_v36 = vsel %vm1219_vm0, %v1583_v32, %v1585_v34  ;;  %v2474_v48 = vsel %vm1219_vm0, %v1589_v42, %v1591_v45 }
  0xa2   : > { %v2488_v2 = vpop.permute.xlu0 %609  ;;  %v2492_v10 = vpop.permute.xlu1 %614 }
  0xab   : > { %v2508_v57 = vpop.permute.xlu0 %624 }
  0xb5   : > { %v572_v61 = vpop.f32.mrf.mxu0 }
  0xb6   : > { %v573_v62 = vadd.f32 %v2485_v59, %v572_v61  ;;  %v2049_v61 = vld [vmem:[#allocation2 + $0x110] sm:$0xff] }
  0xb7   : > { %1287 = vmatpush.bf16.msrb.mxu1 %v2049_v61 }
  0xb8   : > { %v597_v0 = vmax.f32 %v573_v62, 0.0 }
  0xba   : > { %v657_v5 = vmul.f32 %v2488_v2, %v597_v0 }
  0xbb   : > { %v582_v4 = vpop.f32.mrf.mxu2 }
  0xbc   : > { %v667_v12 = vpack.c.bf16 %v657_v5, %v657_v5  ;;  %v583_v16 = vadd.f32 %v2485_v59, %v582_v4 }
  0xbd   : > { %v574_v7 = vpop.f32.mrf.mxu0 }
  0xbe   : > { %v575_v8 = vadd.f32 %v2485_v59, %v574_v7  ;;  %v720_v18 = vunpack.c.l.b16 %v667_v12  ;;  %v601_v25 = vmax.f32 %v583_v16, 0.0  ;;  %v2048_v7 = vld [vmem:[#allocation2 + $0x108] sm:$0xff] }
  0xbf   : > { %1288 = vmatpush.bf16.msrb.mxu1 %v2048_v7 }
  0xc0   : > { %v598_v11 = vmax.f32 %v575_v8, 0.0  ;;  %v661_v38 = vmul.f32 %v2450_v29, %v601_v25 }
  0xc2   : > { %v658_v13 = vmul.f32 %v2492_v10, %v598_v11  ;;  %v671_v51 = vpack.c.bf16 %v661_v38, %v661_v38 }
  0xc3   : > { %v584_v14 = vpop.f32.mrf.mxu2 }
  0xc4   : > { %v668_v17 = vpack.c.bf16 %v658_v13, %v658_v13  ;;  %v585_v19 = vadd.f32 %v2485_v59, %v584_v14  ;;  %v724_v1 = vunpack.c.l.b16 %v671_v51 }
  0xc5   : > { %v577_v20 = vpop.f32.mrf.mxu0 }
  0xc6   : > { %v721_v21 = vunpack.c.l.b16 %v668_v17  ;;  %v602_v22 = vmax.f32 %v585_v19, 0.0  ;;  %v578_v23 = vadd.f32 %v2485_v59, %v577_v20  ;;  %v2035_v17 = vld [vmem:[#allocation2 + $0xa0] sm:$0xff] }
  0xc7   : > { %1031 = vmatpush.bf16.msrb.mxu3 %v2035_v17 }
  0xc8   : > { %v2498_v26 = vpack.c.b16 %v721_v21, %v720_v18  ;;  %v599_v27 = vmax.f32 %v578_v23, 0.0  ;;  %v662_v28 = vmul.f32 %v2455_v33, %v602_v22  ;;  %v2047_v22 = vld [vmem:[#allocation2 + $0x100] sm:$0xff] }
  0xc9   : > { %1289 = vmatpush.bf16.msrb.mxu1 %v2047_v22 }
  0xca   : > { %923 = vmatmul.bf16.vlgmr.msrb.gmra.mxu2 %v2498_v26  ;;  %v659_v41 = vmul.f32 %v2502_v35, %v599_v27  ;;  %v672_v45 = vpack.c.bf16 %v662_v28, %v662_v28  ;;  %v739_v0 = vshll.u32 %v2498_v26, 16  ;;  %v737_v13 = vshrl.u32 %v2498_v26, 16 }
  0xcb   : > { %v587_v30 = vpop.f32.mrf.mxu2 }
  0xcc   : > { %v588_v39 = vadd.f32 %v2485_v59, %v587_v30  ;;  %v669_v54 = vpack.c.bf16 %v659_v41, %v659_v41  ;;  %v725_v58 = vunpack.c.l.b16 %v672_v45  ;;  %v741_v14 = vrot.slane %v739_v0, 1  ;;  %v2034_v41 = vld [vmem:[#allocation2 + $0x98] sm:$0xff] }
  0xcd   : > { %v579_v43 = vpop.f32.mrf.mxu0  ;;  %v1088_v27 = vrot.slane %v737_v13, 1  ;;  %v1089_v28 = vrot.slane %v739_v0, 2  ;;  %1032 = vmatpush.bf16.msrb.mxu3 %v2034_v41 }
  0xce   : > { %v580_v46 = vadd.f32 %v2485_v59, %v579_v43  ;;  %v603_v49 = vmax.f32 %v588_v39, 0.0  ;;  %v722_v3 = vunpack.c.l.b16 %v669_v54  ;;  %v2514_v8 = vpack.c.b16 %v725_v58, %v724_v1 }
  0xcf   : > { %v742_v25 = vor.u32 %v741_v14, %v737_v13  ;;  %v2031_v14 = vld [vmem:[#allocation2 + $0x80] sm:$0xff] }
  0xd0   : > { %v600_v52 = vmax.f32 %v580_v46, 0.0  ;;  %v663_v62 = vmul.f32 %v2452_v31, %v603_v49  ;;  %v752_v21 = vshll.u32 %v2514_v8, 16  ;;  %v1090_v49 = vor.u32 %v1089_v28, %v1088_v27 }
  0xd1   : > { %v969_v58 = vrot.slane %v2514_v8, 1 }
  0xd2   : > { %v660_v60 = vmul.f32 %v2508_v57, %v600_v52  ;;  %v673_v12 = vpack.c.bf16 %v663_v62, %v663_v62  ;;  %v754_v47 = vrot.slane %v752_v21, 1  ;;  %v756_v52 = vshrl.u32 %v2514_v8, 16 }
  0xd3   : > { %v589_v63 = vpop.f32.mrf.mxu2  ;;  %v1096_v17 = vrot.slane %v752_v21, 2 }
  0xd4   : > { %v670_v4 = vpack.c.bf16 %v660_v60, %v660_v60  ;;  %v590_v5 = vadd.f32 %v2485_v59, %v589_v63  ;;  %v726_v23 = vunpack.c.l.b16 %v673_v12  ;;  %v758_v61 = vor.u32 %v756_v52, %v754_v47  ;;  %v2033_v63 = vld [vmem:[#allocation2 + $0x90] sm:$0xff] }
  0xd5   : > { %1033 = vmatpush.bf16.msrb.mxu3 %v2033_v63  ;;  %v966_v63 = vrot.slane %v2498_v26, 1 }
  0xd6   : > { %v723_v9 = vunpack.c.l.b16 %v670_v4  ;;  %v604_v11 = vmax.f32 %v590_v5, 0.0 }
  0xd8   : > { %v2517_v15 = vpack.c.b16 %v723_v9, %v722_v3  ;;  %v664_v16 = vmul.f32 %v2465_v40, %v604_v11 }
  0xd9   : > { %1034 = vmatpush.bf16.msrb.mxu3 %v2032_v6 }
  0xda   : > { %v674_v18 = vpack.c.bf16 %v664_v16, %v664_v16  ;;  %928 = vmatmul.bf16.gmra.mxu2 %v2517_v15  ;;  %v744_v19 = vshll.u32 %v2517_v15, 16  ;;  %v748_v20 = vshrl.u32 %v2517_v15, 16  ;;  %v1095_v16 = vrot.slane %v756_v52, 1 }
  0xdb   : > { %v592_v24 = vpop.f32.mrf.mxu2 }
  0xdc   : > { %v727_v30 = vunpack.c.l.b16 %v674_v18  ;;  %v593_v37 = vadd.f32 %v2485_v59, %v592_v24  ;;  %v746_v38 = vrot.slane %v744_v19, 1  ;;  %v1091_v39 = vrot.slane %v748_v20, 1 }
  0xdd   : > { %v1092_v43 = vrot.slane %v744_v19, 2  ;;  %1035 = vmatpush.bf16.msrb.mxu3 %v2031_v14  ;;  %v1097_v22 = vor.u32 %v1096_v17, %v1095_v16 }
  0xde   : > { %v2525_v45 = vpack.c.b16 %v727_v30, %v726_v23  ;;  %v747_v46 = vsel %vm735_vm1, %v742_v25, %v746_v38  ;;  %v605_v51 = vmax.f32 %v593_v37, 0.0  ;;  %v750_v13 = vor.u32 %v748_v20, %v746_v38 }
  0xdf   : > { %836 = vmatmul.bf16.vlgmr.msra.gmra.mxu1 %v747_v46  ;;  %v1093_v50 = vor.u32 %v1092_v43, %v1091_v39  ;;  %v1221_v38 = vrot.slane %v2517_v15, 2  ;;  %v1220_v39 = vrot.slane %v2498_v26, 2 }
  0xe0   : > { %v760_v54 = vshll.u32 %v2525_v45, 16  ;;  %v971_v60 = vrot.slane %v2525_v45, 1  ;;  %v665_v3 = vmul.f32 %v2468_v44, %v605_v51  ;;  %v755_v19 = vsel %vm735_vm1, %v750_v13, %v754_v47 }
  0xe1   : > { %v1094_v55 = vsel %vm1087_vm2, %v1090_v49, %v1093_v50  ;;  %v764_v23 = vshrl.u32 %v2525_v45, 16  ;;  %v1098_v25 = vsel %vm1087_vm2, %v1093_v50, %v1097_v22  ;;  %v1222_v43 = vsel %vm1219_vm0, %v1220_v39, %v1221_v38 }
  0xe2   : > { %1168 = vmatmul.bf16.vlgmr.msrb.gmra.mxu0 %v1094_v55  ;;  %v762_v62 = vrot.slane %v760_v54, 1  ;;  %v2536_v1 = vsel %vm965_vm3, %v969_v58, %v971_v60  ;;  %v675_v9 = vpack.c.bf16 %v665_v3, %v665_v3  ;;  %v1100_v37 = vrot.slane %v760_v54, 2 }
  0xe3   : > { %v594_v0 = vpop.f32.mrf.mxu2  ;;  %v1099_v30 = vrot.slane %v764_v23, 1  ;;  %v1223_v54 = vrot.slane %v2514_v8, 2  ;;  %v1225_v3 = vrot.slane %v2525_v45, 2 }
  0xe4   : > { %v595_v4 = vadd.f32 %v2485_v59, %v594_v0  ;;  %v763_v5 = vsel %vm735_vm1, %v758_v61, %v762_v62  ;;  %v728_v44 = vunpack.c.l.b16 %v675_v9  ;;  %v766_v27 = vor.u32 %v764_v23, %v762_v62 }
  0xe5   : > { %846 = vmatmul.bf16.vlgmr.msra.gmra.mxu3 %v763_v5  ;;  %v1101_v41 = vor.u32 %v1100_v37, %v1099_v30  ;;  %v967_v61 = vrot.slane %v2517_v15, 1 }
  0xe6   : > { %v606_v7 = vmax.f32 %v595_v4, 0.0  ;;  %v861_v50 = vpack.c.b16 %v728_v44, %v728_v44  ;;  %v1226_v4 = vsel %vm1219_vm0, %v1223_v54, %v1225_v3 }
  0xe7   : > { %v1102_v46 = vsel %vm1087_vm2, %v1097_v22, %v1101_v41  ;;  %v968_v0 = vsel %vm965_vm3, %v966_v63, %v967_v61  ;;  %v970_v5 = vsel %vm965_vm3, %v967_v61, %v969_v58  ;;  %v2593_v61 = vld [vmem:[%s2801_s6] ss:$0 sm:$0xff] }
  0xe8   : > { %v666_v11 = vmul.f32 %v2476_v53, %v606_v7 }
  0xea   : > { %v676_v12 = vpack.c.bf16 %v666_v11, %v666_v11  ;;  %933 = vmatmul.bf16.gmra.mxu2 %v2514_v8 }
  0xec   : > { %v729_v18 = vunpack.c.l.b16 %v676_v12 }
  0xee   : > { %v734_v59 = vpack.c.b16 %v729_v18, %v728_v44 }
  0xef   : > { %841 = vmatmul.bf16.gmra.mxu1 %v755_v19 }
  0xf0   : > { %v768_v24 = vshll.u32 %v734_v59, 16  ;;  %v973_v53 = vrot.slane %v734_v59, 1  ;;  %v772_v47 = vshrl.u32 %v734_v59, 16  ;;  %v1227_v15 = vrot.slane %v734_v59, 2 }
  0xf2   : > { %1173 = vmatmul.bf16.gmra.mxu0 %v1098_v25  ;;  %v770_v20 = vrot.slane %v768_v24, 1  ;;  %v974_v28 = vsel %vm965_vm3, %v971_v60, %v973_v53  ;;  %v1103_v51 = vrot.slane %v772_v47, 1  ;;  %v1104_v52 = vrot.slane %v768_v24, 2 }
  0xf3   : > { %v1224_v60 = vsel %vm1219_vm0, %v1221_v38, %v1223_v54  ;;  %v1228_v6 = vsel %vm1219_vm0, %v1225_v3, %v1227_v15 }
  0xf4   : > { %v771_v21 = vsel %vm735_vm1, %v766_v27, %v770_v20  ;;  %v774_v49 = vor.u32 %v772_v47, %v770_v20  ;;  %v1105_v55 = vor.u32 %v1104_v52, %v1103_v51 }
  0xf5   : > { %851 = vmatmul.bf16.gmra.mxu3 %v771_v21 }
  0xf6   : > { %v1106_v62 = vsel %vm1087_vm2, %v1101_v41, %v1105_v55 }
  0xfa   : > { %938 = vmatmul.bf16.gmra.mxu2 %v2525_v45 }
  0xff   : > { %1290 = vmatmul.bf16.vlgmr.msrb.gmra.mxu1 %v1222_v43 }
 0x102   : > { %1178 = vmatmul.bf16.gmra.mxu0 %v1102_v46 }
 0x105   : > { %856 = vmatmul.bf16.gmra.mxu3 %v774_v49 }
 0x10a   : > { %943 = vmatmul.bf16.gmra.mxu2 %v861_v50 }
 0x10f   : > { %1295 = vmatmul.bf16.gmra.mxu1 %v1224_v60 }
 0x112   : > { %1183 = vmatmul.bf16.gmra.mxu0 %v1106_v62 }
 0x115   : > { %1036 = vmatmul.bf16.vlgmr.msrb.gmra.mxu3 %v968_v0  ;;  %v1337_v0 = vld [vmem:[%s2588_s16] sm:$0xff] }
 0x11f   : > { %1300 = vmatmul.bf16.gmra.mxu1 %v1226_v4 }
 0x122   : > { %1188 = vmatmul.bf16.gmra.mxu0 %v1105_v55 }
 0x125   : > { %1041 = vmatmul.bf16.gmra.mxu3 %v970_v5 }
 0x12f   : > { %1305 = vmatmul.bf16.gmra.mxu1 %v1228_v6 }
 0x135   : > { %1046 = vmatmul.bf16.gmra.mxu3 %v2536_v1 }
 0x13f   : > { %1310 = vmatmul.bf16.gmra.mxu1 %v1227_v15 }
 0x145   : > { %1051 = vmatmul.bf16.gmra.mxu3 %v974_v28 }
 0x14d   : > { %v924_v26 = vpop.f32.mrf.mxu2 }
 0x155   : > { %v926_v7 = vpop.f32.mrf.mxu2  ;;  %1056 = vmatmul.bf16.gmra.mxu3 %v973_v53 }
 0x15c   : > { %v837_v45 = vpop.f32.mrf.mxu1 }
 0x15d   : > { %v929_v9 = vpop.f32.mrf.mxu2  ;;  %v925_v51 = vadd.f32 %v924_v26, %v837_v45 }
 0x15f   : > { %v1169_v11 = vpop.f32.mrf.mxu0 }
 0x164   : > { %v839_v12 = vpop.f32.mrf.mxu1 }
 0x165   : > { %v2566_v13 = vpop.f32.mrf.mxu2  ;;  %v927_v3 = vadd.f32 %v926_v7, %v839_v12 }
 0x167   : > { %v1171_v8 = vpop.f32.mrf.mxu0 }
 0x168   : > { %v847_v58 = vpop.f32.mrf.mxu3 }
 0x16c   : > { %v842_v14 = vpop.f32.mrf.mxu1 }
 0x16d   : > { %v934_v16 = vpop.f32.mrf.mxu2 }
 0x16e   : > { %v2568_v17 = vadd.f32 %v934_v16, %v847_v58  ;;  %v1338_v16 = vld [vmem:[%s2588_s16 + $0x8] sm:$0xff] }
 0x16f   : > { %v1174_v44 = vpop.f32.mrf.mxu0 }
 0x170   : > { %v849_v18 = vpop.f32.mrf.mxu3 }
 0x174   : > { %v844_v1 = vpop.f32.mrf.mxu1 }
 0x175   : > { %v936_v59 = vpop.f32.mrf.mxu2 }
 0x176   : > { %v2570_v19 = vadd.f32 %v936_v59, %v849_v18  ;;  %v930_v18 = vadd.f32 %v929_v9, %v842_v14 }
 0x177   : > { %v1176_v22 = vpop.f32.mrf.mxu0 }
 0x178   : > { %v852_v23 = vpop.f32.mrf.mxu3 }
 0x17c   : > { %v1291_v24 = vpop.f32.mrf.mxu1 }
 0x17d   : > { %v939_v53 = vpop.f32.mrf.mxu2 }
 0x17e   : > { %v2572_v25 = vadd.f32 %v939_v53, %v852_v23 }
 0x17f   : > { %v1179_v27 = vpop.f32.mrf.mxu0 }
 0x180   : > { %v854_v20 = vpop.f32.mrf.mxu3 }
 0x184   : > { %v1293_v28 = vpop.f32.mrf.mxu1 }
 0x185   : > { %v941_v21 = vpop.f32.mrf.mxu2 }
 0x186   : > { %v2574_v30 = vadd.f32 %v941_v21, %v854_v20 }
 0x187   : > { %v2576_v37 = vpop.f32.mrf.mxu0 }
 0x188   : > { %v857_v38 = vpop.f32.mrf.mxu3 }
 0x18c   : > { %v1296_v39 = vpop.f32.mrf.mxu1 }
 0x18d   : > { %v944_v41 = vpop.f32.mrf.mxu2 }
 0x18e   : > { %v2578_v43 = vadd.f32 %v944_v41, %v857_v38  ;;  %v932_v38 = vadd.f32 %v2566_v13, %v844_v1 }
 0x18f   : > { %v2580_v46 = vpop.f32.mrf.mxu0 }
 0x190   : > { %v859_v47 = vpop.f32.mrf.mxu3 }
 0x194   : > { %v1298_v49 = vpop.f32.mrf.mxu1 }
 0x195   : > { %v946_v50 = vpop.f32.mrf.mxu2 }
 0x197   : > { %v2582_v52 = vpop.f32.mrf.mxu0 }
 0x198   : > { %v1037_v54 = vpop.f32.mrf.mxu3 }
 0x199   : > { %v1061_v55 = vadd.f32 %v1037_v54, %v925_v51 }
 0x19b   : > { %v1193_v60 = vadd.f32 %v1169_v11, %v1061_v55 }
 0x19c   : > { %v1301_v62 = vpop.f32.mrf.mxu1 }
 0x19d   : > { %v1315_v63 = vadd.f32 %v1291_v24, %v1193_v60 }
 0x19f   : > { %v2596_v4 = vpop.f32.mrf.mxu0  ;;  %v1328_v5 = vadd.f32 %v2593_v61, %v1315_v63 }
 0x1a0   : > { %v1039_v15 = vpop.f32.mrf.mxu3 }
 0x1a1   : > { %v1062_v6 = vadd.f32 %v1039_v15, %v927_v3  ;;  %v2599_v26 = vadd.f32 %v1337_v0, %v1328_v5  ;;  %v1341_v0 = vld [vmem:[%s2588_s16 + $0x20] sm:$0xff] }
 0x1a3   : > { %v1194_v45 = vadd.f32 %v1171_v8, %v1062_v6  ;;  %1355 = vadd.xlane.f32.xlu1 %v2599_v26  ;;  %v1339_v8 = vld [vmem:[%s2588_s16 + $0x10] sm:$0xff] }
 0x1a4   : > { %v1303_v11 = vpop.f32.mrf.mxu1 }
 0x1a5   : > { %v1316_v58 = vadd.f32 %v1293_v28, %v1194_v45 }
 0x1a7   : > { %v1191_v59 = vpop.f32.mrf.mxu0  ;;  %v1329_v23 = vadd.f32 %v2593_v61, %v1316_v58 }
 0x1a8   : > { %v1042_v7 = vpop.f32.mrf.mxu3  ;;  %v1343_v59 = vld [vmem:[%s2588_s16 + $0x30] sm:$0xff] }
 0x1a9   : > { %v1063_v12 = vadd.f32 %v1042_v7, %v930_v18  ;;  %v2604_v24 = vadd.f32 %v1338_v16, %v1329_v23 }
 0x1ab   : > { %v1195_v53 = vadd.f32 %v1174_v44, %v1063_v12  ;;  %1357 = vadd.xlane.f32.xlu2 %v2604_v24  ;;  %v1340_v44 = vld [vmem:[%s2588_s16 + $0x18] sm:$0xff] }
 0x1ac   : > { %v1306_v20 = vpop.f32.mrf.mxu1 }
 0x1ad   : > { %v1317_v21 = vadd.f32 %v1296_v39, %v1195_v53 }
 0x1af   : > { %v1330_v28 = vadd.f32 %v2593_v61, %v1317_v21 }
 0x1b0   : > { %v1044_v41 = vpop.f32.mrf.mxu3 }
 0x1b1   : > { %v1064_v9 = vadd.f32 %v1044_v41, %v932_v38  ;;  %v2610_v14 = vadd.f32 %v1339_v8, %v1330_v28  ;;  %v1345_v41 = vld [vmem:[%s2588_s16 + $0x40] sm:$0xff] }
 0x1b3   : > { %v1196_v47 = vadd.f32 %v1176_v22, %v1064_v9  ;;  %1359 = vadd.xlane.f32.xlu0 %v2610_v14 }
 0x1b4   : > { %v1308_v50 = vpop.f32.mrf.mxu1 }
 0x1b5   : > { %v1318_v51 = vadd.f32 %v1298_v49, %v1196_v47 }
 0x1b7   : > { %v1331_v54 = vadd.f32 %v2593_v61, %v1318_v51 }
 0x1b8   : > { %v1047_v55 = vpop.f32.mrf.mxu3 }
 0x1b9   : > { %v1065_v39 = vadd.f32 %v1047_v55, %v2568_v17  ;;  %v2616_v13 = vadd.f32 %v1340_v44, %v1331_v54  ;;  %v2291_v54 = vmov 0.0  }
 0x1bb   : > { %v1197_v1 = vadd.f32 %v1179_v27, %v1065_v39  ;;  %1361 = vadd.xlane.f32.xlu2 %v2616_v13  ;;  %v1342_v27 = vld [vmem:[%s2588_s16 + $0x28] sm:$0xff] }
 0x1bc   : > { %v1311_v60 = vpop.f32.mrf.mxu1 }
 0x1bd   : > { %v1319_v63 = vadd.f32 %v1301_v62, %v1197_v1 }
 0x1bf   : > { %v1332_v22 = vadd.f32 %v2593_v61, %v1319_v63 }
 0x1c0   : > { %v1049_v3 = vpop.f32.mrf.mxu3 }
 0x1c1   : > { %v1066_v49 = vadd.f32 %v1049_v3, %v2570_v19  ;;  %v2622_v5 = vadd.f32 %v1341_v0, %v1332_v22 }
 0x1c3   : > { %v1198_v15 = vadd.f32 %v2576_v37, %v1066_v49  ;;  %1363 = vadd.xlane.f32.xlu1 %v2622_v5 }
 0x1c4   : > { %v1313_v17 = vpop.f32.mrf.mxu1 }
 0x1c5   : > { %v1320_v6 = vadd.f32 %v1303_v11, %v1198_v15 }
 0x1c7   : > { %v1333_v45 = vadd.f32 %v2593_v61, %v1320_v6 }
 0x1c8   : > { %v1052_v62 = vpop.f32.mrf.mxu3 }
 0x1c9   : > { %v1067_v58 = vadd.f32 %v1052_v62, %v2572_v25  ;;  %v2629_v16 = vadd.f32 %v1342_v27, %v1333_v45  ;;  %v1344_v25 = vld [vmem:[%s2588_s16 + $0x38] sm:$0xff]  ;;  %s2223_s16 = scalar_lea.hbm %s2804_s9, 144 }
 0x1ca   : > { %p2225_p6 = scmp.lt.s32.totalorder %s2223_s16, %s2219_s25 }
 0x1cb   : > { %v1199_v18 = vadd.f32 %v2580_v46, %v1067_v58  ;;  %1365 = vadd.xlane.f32.xlu2 %v2629_v16 }
 0x1cc   : > { %p2226_p7 = por %p2225_p6, %p2224_p5 }
 0x1cd   : > { %v1321_v19 = vadd.f32 %v1306_v20, %v1199_v18 }
 0x1ce   : > { %p2227_p9 = pnand %p2226_p7, %p2222_p3 }
 0x1cf   : > { %v1334_v37 = vadd.f32 %v2593_v61, %v1321_v19 }
 0x1d0   : > { %v1054_v23 = vpop.f32.mrf.mxu3 }
 0x1d1   : > { %v1068_v11 = vadd.f32 %v1054_v23, %v2574_v30  ;;  %v1352_v7 = vadd.f32 %v1343_v59, %v1334_v37 }
 0x1d3   : > { %v1200_v12 = vadd.f32 %v2582_v52, %v1068_v11  ;;  %1367 = vadd.xlane.f32.xlu0 %v1352_v7  ;;  %v1391_v52 = vlaneseq }
 0x1d5   : > { %v1322_v53 = vadd.f32 %v1308_v50, %v1200_v12  ;;  %v1392_v51 = vand.u32 127, %v1391_v52 }
 0x1d7   : > { %v1335_v21 = vadd.f32 %v2593_v61, %v1322_v53  ;;  %vm1393_vm4 = vcmp.lt.s32.totalorder %v1392_v51, 16 }
 0x1d8   : > { %v1057_v8 = vpop.f32.mrf.mxu3  ;;  %v1998_v55 = vsel %vm1393_vm4, 1.0, %v2291_v54 }
 0x1d9   : > { %v1069_v46 = vadd.f32 %v1057_v8, %v2578_v43  ;;  %v1353_v38 = vadd.f32 %v1344_v25, %v1335_v21 }
 0x1db   : > { %v1201_v20 = vadd.f32 %v2596_v4, %v1069_v46  ;;  %1369 = vadd.xlane.f32.xlu1 %v1353_v38 }
 0x1dd   : > { %v1323_v28 = vadd.f32 %v1311_v60, %v1201_v20 }
 0x1df   : > { %v1336_v9 = vadd.f32 %v2593_v61, %v1323_v28 }
 0x1e0   : > { %v1059_v30 = vpop.f32.mrf.mxu3 }
 0x1e1   : > { %v1354_v47 = vadd.f32 %v1345_v41, %v1336_v9 }
 0x1e3   : > { %1371 = vadd.xlane.f32.xlu2 %v1354_v47 }
 0x216   : > { %v1356_v50 = vpop.xlane.xlu1 %1355 }
 0x217   : > { %v1373_v44 = vmul.f32 0.0625, %v1356_v50 }
 0x219   : > { %v1382_v43 = vsub.f32 %v2599_v26, %v1373_v44 }
 0x21b   : > { %v2644_v39 = vmul.f32 %v1998_v55, %v1382_v43 }
 0x21d   : > { %v1405_v4 = vmul.f32 %v2644_v39, %v2644_v39 }
 0x21e   : > { %v1358_v1 = vpop.xlane.xlu2 %1357 }
 0x21f   : > { %v1374_v60 = vmul.f32 0.0625, %v1358_v1  ;;  %1414 = vadd.xlane.f32.xlu0 %v1405_v4 }
 0x221   : > { %v1383_v61 = vsub.f32 %v2604_v24, %v1374_v60 }
 0x223   : > { %v2649_v63 = vmul.f32 %v1998_v55, %v1383_v61 }
 0x225   : > { %v1406_v0 = vmul.f32 %v2649_v63, %v2649_v63 }
 0x226   : > { %v1360_v22 = vpop.xlane.xlu0 %1359 }
 0x227   : > { %v1375_v3 = vmul.f32 0.0625, %v1360_v22  ;;  %1416 = vadd.xlane.f32.xlu1 %v1406_v0 }
 0x229   : > { %v1384_v26 = vsub.f32 %v2610_v14, %v1375_v3 }
 0x22b   : > { %v2654_v49 = vmul.f32 %v1998_v55, %v1384_v26 }
 0x22d   : > { %v1407_v15 = vmul.f32 %v2654_v49, %v2654_v49 }
 0x22e   : > { %v1362_v17 = vpop.xlane.xlu2 %1361 }
 0x22f   : > { %v1376_v6 = vmul.f32 0.0625, %v1362_v17  ;;  %1418 = vadd.xlane.f32.xlu2 %v1407_v15  ;;  %v2689_v17 = vld [vmem:[%s2802_s7] ss:$0 sm:$0xff] }
 0x231   : > { %v1385_v24 = vsub.f32 %v2616_v13, %v1376_v6 }
 0x233   : > { %v2659_v27 = vmul.f32 %v1998_v55, %v1385_v24 }
 0x235   : > { %v1408_v45 = vmul.f32 %v2659_v27, %v2659_v27 }
 0x236   : > { %v1364_v62 = vpop.xlane.xlu1 %1363 }
 0x237   : > { %v1377_v58 = vmul.f32 0.0625, %v1364_v62  ;;  %1420 = vadd.xlane.f32.xlu0 %v1408_v45  ;;  %v2694_v45 = vld [vmem:[%s2803_s8] ss:$0 sm:$0xff] }
 0x239   : > { %v1386_v14 = vsub.f32 %v2622_v5, %v1377_v58  ;;  %v1577_v58 = vrot.slane %v2492_v10, 2 }
 0x23b   : > { %v2664_v18 = vmul.f32 %v1998_v55, %v1386_v14  ;;  %v1576_v14 = vrot.slane %v2488_v2, 2 }
 0x23d   : > { %v1409_v19 = vmul.f32 %v2664_v18, %v2664_v18 }
 0x23e   : > { %v1366_v59 = vpop.xlane.xlu2 %1365 }
 0x23f   : > { %v1378_v37 = vmul.f32 0.0625, %v1366_v59  ;;  %1422 = vadd.xlane.f32.xlu1 %v1409_v19 }
 0x241   : > { %v1387_v13 = vsub.f32 %v2629_v16, %v1378_v37 }
 0x243   : > { %v2669_v23 = vmul.f32 %v1998_v55, %v1387_v13 }
 0x245   : > { %v1410_v11 = vmul.f32 %v2669_v23, %v2669_v23 }
 0x246   : > { %v1368_v12 = vpop.xlane.xlu0 %1367 }
 0x247   : > { %v1379_v53 = vmul.f32 0.0625, %v1368_v12  ;;  %1424 = vadd.xlane.f32.xlu2 %v1410_v11 }
 0x249   : > { %v1388_v25 = vsub.f32 %v1352_v7, %v1379_v53 }
 0x24b   : > { %v2673_v5 = vmul.f32 %v1998_v55, %v1388_v25 }
 0x24d   : > { %v1411_v21 = vmul.f32 %v2673_v5, %v2673_v5 }
 0x24e   : > { %v1370_v8 = vpop.xlane.xlu1 %1369 }
 0x24f   : > { %v1380_v46 = vmul.f32 0.0625, %v1370_v8  ;;  %1426 = vadd.xlane.f32.xlu0 %v1411_v21  ;;  %v1578_v21 = vsel %vm1219_vm0, %v1576_v14, %v1577_v58 }
 0x251   : > { %v1389_v20 = vsub.f32 %v1353_v38, %v1380_v46 }
 0x253   : > { %v2677_v28 = vmul.f32 %v1998_v55, %v1389_v20 }
 0x255   : > { %v1412_v16 = vmul.f32 %v2677_v28, %v2677_v28 }
 0x256   : > { %v1372_v41 = vpop.xlane.xlu2 %1371 }
 0x257   : > { %v1381_v9 = vmul.f32 0.0625, %v1372_v41  ;;  %1428 = vadd.xlane.f32.xlu1 %v1412_v16 }
 0x259   : > { %v1390_v30 = vsub.f32 %v1354_v47, %v1381_v9 }
 0x25b   : > { %v2681_v52 = vmul.f32 %v1998_v55, %v1390_v30 }
 0x25d   : > { %v1413_v7 = vmul.f32 %v2681_v52, %v2681_v52 }
 0x25f   : > { %1430 = vadd.xlane.f32.xlu2 %v1413_v7  ;;  %v1579_v7 = vrot.slane %v2502_v35, 2  ;;  %v1581_v35 = vrot.slane %v2508_v57, 2 }
 0x292   : > { %v1415_v51 = vpop.xlane.xlu0 %1414 }
 0x293   : > { %v1432_v50 = vmul.f32 0.0625, %v1415_v51 }
 0x295   : > { %v1441_v44 = vadd.f32 1e-05, %v1432_v50 }
 0x297   : > { %2155 = vrsqrt.f32 %v1441_v44  ;;  %vm1456_vm6 = vweird.f32 %v1441_v44 }
 0x29a   : > { %v1417_v38 = vpop.xlane.xlu1 %1416 }
 0x29b   : > { %v1433_v54 = vmul.f32 0.0625, %v1417_v38 }
 0x29d   : > { %v2156_v43 = vpop.eup %2155  ;;  %v1442_v4 = vadd.f32 1e-05, %v1433_v54  ;;  %v1580_v54 = vsel %vm1219_vm0, %v1577_v58, %v1579_v7 }
 0x29e   : > { %v1451_v1 = vmul.f32 %v2156_v43, %v1441_v44  ;;  %vm1457_vm5 = vweird.f32 %v2156_v43 }
 0x29f   : > { %2157 = vrsqrt.f32 %v1442_v4  ;;  %vm1458_vm7 = vmor %vm1456_vm6, %vm1457_vm5  ;;  %vm1466_vm9 = vweird.f32 %v1442_v4 }
 0x2a0   : > { %v1452_v60 = vmul.f32 %v2156_v43, %v1451_v1 }
 0x2a2   : > { %v1453_v61 = vmul.f32 0.5, %v1452_v60  ;;  %v1419_v47 = vpop.xlane.xlu2 %1418 }
 0x2a3   : > { %v1434_v55 = vmul.f32 0.0625, %v1419_v47 }
 0x2a4   : > { %v1454_v0 = vsub.f32 1.5, %v1453_v61 }
 0x2a5   : > { %v2158_v22 = vpop.eup %2157  ;;  %v1443_v3 = vadd.f32 1e-05, %v1434_v55 }
 0x2a6   : > { %v1455_v26 = vmul.f32 %v2156_v43, %v1454_v0  ;;  %v1461_v15 = vmul.f32 %v2158_v22, %v1442_v4  ;;  %vm1467_vm8 = vweird.f32 %v2158_v22 }
 0x2a7   : > { %2159 = vrsqrt.f32 %v1443_v3  ;;  %vm1468_vm10 = vmor %vm1466_vm9, %vm1467_vm8  ;;  %vm1476_vm12 = vweird.f32 %v1443_v3 }
 0x2a8   : > { %v1459_v6 = vsel %vm1458_vm7, %v2156_v43, %v1455_v26  ;;  %v1462_v24 = vmul.f32 %v2158_v22, %v1461_v15 }
 0x2a9   : > { %v1540_v62 = vmul.f32 %v1459_v6, %v2644_v39 }
 0x2aa   : > { %v1463_v19 = vmul.f32 0.5, %v1462_v24  ;;  %v1421_v59 = vpop.xlane.xlu0 %1420  ;;  %v1582_v24 = vsel %vm1219_vm0, %v1579_v7, %v1581_v35 }
 0x2ab   : > { %v1553_v37 = vmul.f32 %v2689_v17, %v1540_v62  ;;  %v1435_v13 = vmul.f32 0.0625, %v1421_v59 }
 0x2ac   : > { %v1464_v11 = vsub.f32 1.5, %v1463_v19 }
 0x2ad   : > { %v2160_v12 = vpop.eup %2159  ;;  %v1566_v53 = vadd.f32 %v2694_v45, %v1553_v37  ;;  %v1444_v25 = vadd.f32 1e-05, %v1435_v13 }
 0x2ae   : > { %v1465_v39 = vmul.f32 %v2158_v22, %v1464_v11  ;;  %v1471_v10 = vmul.f32 %v2160_v12, %v1443_v3  ;;  %vm1477_vm11 = vweird.f32 %v2160_v12 }
 0x2af   : > { %v1604_v8 = vmul.f32 %v1578_v21, %v1566_v53  ;;  %2161 = vrsqrt.f32 %v1444_v25  ;;  %vm1478_vm13 = vmor %vm1476_vm12, %vm1477_vm11  ;;  %vm1486_vm15 = vweird.f32 %v1444_v25 }
 0x2b0   : > { %v1469_v2 = vsel %vm1468_vm10, %v2158_v22, %v1465_v39  ;;  %v1472_v46 = vmul.f32 %v2160_v12, %v1471_v10  ;;  %v1584_v39 = vsel %vm1219_vm0, %v1581_v35, %v1583_v32 }
 0x2b1   : > { %1613 = vst [vmem:[%s2704_s28] sm:$0xff] %v1604_v8  ;;  %v1541_v20 = vmul.f32 %v1469_v2, %v2649_v63 }
 0x2b2   : > { %v1473_v16 = vmul.f32 0.5, %v1472_v46  ;;  %v1423_v41 = vpop.xlane.xlu1 %1422 }
 0x2b3   : > { %v1554_v9 = vmul.f32 %v2689_v17, %v1541_v20  ;;  %v1436_v30 = vmul.f32 0.0625, %v1423_v41 }
 0x2b4   : > { %v1474_v51 = vsub.f32 1.5, %v1473_v16 }
 0x2b5   : > { %v2162_v50 = vpop.eup %2161  ;;  %v1567_v44 = vadd.f32 %v2694_v45, %v1554_v9  ;;  %v1445_v38 = vadd.f32 1e-05, %v1436_v30 }
 0x2b6   : > { %v1475_v43 = vmul.f32 %v2160_v12, %v1474_v51  ;;  %v1481_v4 = vmul.f32 %v2162_v50, %v1444_v25  ;;  %vm1487_vm14 = vweird.f32 %v2162_v50 }
 0x2b7   : > { %v1605_v63 = vmul.f32 %v1580_v54, %v1567_v44  ;;  %2163 = vrsqrt.f32 %v1445_v38  ;;  %vm1488_vm1 = vmor %vm1486_vm15, %vm1487_vm14  ;;  %vm1496_vm3 = vweird.f32 %v1445_v38 }
 0x2b8   : > { %v1479_v1 = vsel %vm1478_vm13, %v2160_v12, %v1475_v43  ;;  %v1482_v60 = vmul.f32 %v2162_v50, %v1481_v4  ;;  %v1587_v4 = vrot.slane %v2452_v31, 2 }
 0x2b9   : > { %1614 = vst [vmem:[%s2704_s28 + $0x8] sm:$0xff] %v1605_v63  ;;  %v1542_v61 = vmul.f32 %v1479_v1, %v2654_v49 }
 0x2ba   : > { %v1483_v47 = vmul.f32 0.5, %v1482_v60  ;;  %v1425_v55 = vpop.xlane.xlu2 %1424 }
 0x2bb   : > { %v1555_v0 = vmul.f32 %v2689_v17, %v1542_v61  ;;  %v1437_v22 = vmul.f32 0.0625, %v1425_v55 }
 0x2bc   : > { %v1484_v26 = vsub.f32 1.5, %v1483_v47 }
 0x2bd   : > { %v2164_v3 = vpop.eup %2163  ;;  %v1568_v15 = vadd.f32 %v2694_v45, %v1555_v0  ;;  %v1446_v6 = vadd.f32 1e-05, %v1437_v22  ;;  %v1588_v0 = vsel %vm1219_vm0, %v1585_v34, %v1587_v4 }
 0x2be   : > { %v1485_v62 = vmul.f32 %v2162_v50, %v1484_v26  ;;  %v1491_v58 = vmul.f32 %v2164_v3, %v1445_v38  ;;  %vm1497_vm2 = vweird.f32 %v2164_v3 }
 0x2bf   : > { %v1606_v49 = vmul.f32 %v1582_v24, %v1568_v15  ;;  %2165 = vrsqrt.f32 %v1446_v6  ;;  %vm1498_vm4 = vmor %vm1496_vm3, %vm1497_vm2  ;;  %vm1506_vm6 = vweird.f32 %v1446_v6 }
 0x2c0   : > { %v1489_v57 = vsel %vm1488_vm1, %v2162_v50, %v1485_v62  ;;  %v1492_v14 = vmul.f32 %v2164_v3, %v1491_v58  ;;  %v1590_v58 = vsel %vm1219_vm0, %v1587_v4, %v1589_v42 }
 0x2c1   : > { %1615 = vst [vmem:[%s2704_s28 + $0x10] sm:$0xff] %v1606_v49  ;;  %v1543_v19 = vmul.f32 %v1489_v57, %v2659_v27 }
 0x2c2   : > { %v1493_v59 = vmul.f32 0.5, %v1492_v14  ;;  %v1427_v37 = vpop.xlane.xlu0 %1426 }
 0x2c3   : > { %v1556_v13 = vmul.f32 %v2689_v17, %v1543_v19  ;;  %v1438_v11 = vmul.f32 0.0625, %v1427_v37 }
 0x2c4   : > { %v1494_v12 = vsub.f32 1.5, %v1493_v59 }
 0x2c5   : > { %v2166_v53 = vpop.eup %2165  ;;  %v1569_v25 = vadd.f32 %v2694_v45, %v1556_v13  ;;  %v1447_v21 = vadd.f32 1e-05, %v1438_v11 }
 0x2c6   : > { %v1495_v10 = vmul.f32 %v2164_v3, %v1494_v12  ;;  %v1501_v8 = vmul.f32 %v2166_v53, %v1446_v6  ;;  %vm1507_vm5 = vweird.f32 %v2166_v53 }
 0x2c7   : > { %v1607_v27 = vmul.f32 %v1584_v39, %v1569_v25  ;;  %2167 = vrsqrt.f32 %v1447_v21  ;;  %vm1508_vm7 = vmor %vm1506_vm6, %vm1507_vm5  ;;  %vm1516_vm9 = vweird.f32 %v1447_v21 }
 0x2c8   : > { %v1499_v2 = vsel %vm1498_vm4, %v2164_v3, %v1495_v10  ;;  %v1502_v46 = vmul.f32 %v2166_v53, %v1501_v8 }
 0x2c9   : > { %1616 = vst [vmem:[%s2704_s28 + $0x18] sm:$0xff] %v1607_v27  ;;  %v1544_v20 = vmul.f32 %v1499_v2, %v2664_v18 }
 0x2ca   : > { %v1503_v16 = vmul.f32 0.5, %v1502_v46  ;;  %v1429_v41 = vpop.xlane.xlu1 %1428 }
 0x2cb   : > { %v1557_v9 = vmul.f32 %v2689_v17, %v1544_v20  ;;  %v1439_v30 = vmul.f32 0.0625, %v1429_v41 }
 0x2cc   : > { %v1504_v29 = vsub.f32 1.5, %v1503_v16 }
 0x2cd   : > { %v2168_v32 = vpop.eup %2167  ;;  %v1570_v7 = vadd.f32 %v2694_v45, %v1557_v9  ;;  %v1448_v51 = vadd.f32 1e-05, %v1439_v30 }
 0x2ce   : > { %v1505_v50 = vmul.f32 %v2166_v53, %v1504_v29  ;;  %v1511_v44 = vmul.f32 %v2168_v32, %v1447_v21  ;;  %vm1517_vm8 = vweird.f32 %v2168_v32 }
 0x2cf   : > { %v1608_v38 = vmul.f32 %v2463_v36, %v1570_v7  ;;  %2169 = vrsqrt.f32 %v1448_v51  ;;  %vm1518_vm10 = vmor %vm1516_vm9, %vm1517_vm8  ;;  %vm1526_vm12 = vweird.f32 %v1448_v51 }
 0x2d0   : > { %v1509_v18 = vsel %vm1508_vm7, %v2166_v53, %v1505_v50  ;;  %v1512_v54 = vmul.f32 %v2168_v32, %v1511_v44 }
 0x2d1   : > { %1617 = vst [vmem:[%s2704_s28 + $0x20] sm:$0xff] %v1608_v38  ;;  %v1545_v43 = vmul.f32 %v1509_v18, %v2669_v23 }
 0x2d2   : > { %v1513_v63 = vmul.f32 0.5, %v1512_v54  ;;  %v1431_v1 = vpop.xlane.xlu2 %1430 }
 0x2d3   : > { %v1558_v60 = vmul.f32 %v2689_v17, %v1545_v43  ;;  %v1440_v61 = vmul.f32 0.0625, %v1431_v1 }
 0x2d4   : > { %v1514_v35 = vsub.f32 1.5, %v1513_v63 }
 0x2d5   : > { %v2170_v47 = vpop.eup %2169  ;;  %v1571_v36 = vadd.f32 %v2694_v45, %v1558_v60  ;;  %v1449_v55 = vadd.f32 1e-05, %v1440_v61 }
 0x2d6   : > { %v1515_v22 = vmul.f32 %v2168_v32, %v1514_v35  ;;  %v1521_v23 = vmul.f32 %v2170_v47, %v1448_v51  ;;  %vm1527_vm11 = vweird.f32 %v2170_v47 }
 0x2d7   : > { %v1609_v31 = vmul.f32 %v1588_v0, %v1571_v36  ;;  %2171 = vrsqrt.f32 %v1449_v55  ;;  %vm1528_vm13 = vmor %vm1526_vm12, %vm1527_vm11  ;;  %vm1536_vm0 = vweird.f32 %v1449_v55 }
 0x2d8   : > { %v1519_v26 = vsel %vm1518_vm10, %v2168_v32, %v1515_v22  ;;  %v1522_v3 = vmul.f32 %v2170_v47, %v1521_v23 }
 0x2d9   : > { %1618 = vst [vmem:[%s2704_s28 + $0x28] sm:$0xff] %v1609_v31  ;;  %v1546_v15 = vmul.f32 %v1519_v26, %v2673_v5 }
 0x2da   : > { %v1523_v6 = vmul.f32 0.5, %v1522_v3 }
 0x2db   : > { %v1559_v24 = vmul.f32 %v2689_v17, %v1546_v15 }
 0x2dc   : > { %v1524_v62 = vsub.f32 1.5, %v1523_v6 }
 0x2dd   : > { %v2172_v33 = vpop.eup %2171  ;;  %v1572_v34 = vadd.f32 %v2694_v45, %v1559_v24 }
 0x2de   : > { %v1525_v49 = vmul.f32 %v2170_v47, %v1524_v62  ;;  %v1531_v57 = vmul.f32 %v2172_v33, %v1449_v55  ;;  %vm1537_vm14 = vweird.f32 %v2172_v33 }
 0x2df   : > { %v1610_v14 = vmul.f32 %v1590_v58, %v1572_v34  ;;  %vm1538_vm15 = vmor %vm1536_vm0, %vm1537_vm14 }
 0x2e0   : > { %v1529_v5 = vsel %vm1528_vm13, %v2170_v47, %v1525_v49  ;;  %v1532_v19 = vmul.f32 %v2172_v33, %v1531_v57 }
 0x2e1   : > { %1619 = vst [vmem:[%s2704_s28 + $0x30] sm:$0xff] %v1610_v14  ;;  %v1547_v59 = vmul.f32 %v1529_v5, %v2677_v28 }
 0x2e2   : > { %v1533_v37 = vmul.f32 0.5, %v1532_v19 }
 0x2e3   : > { %v1560_v13 = vmul.f32 %v2689_v17, %v1547_v59 }
 0x2e4   : > { %v1534_v11 = vsub.f32 1.5, %v1533_v37 }
 0x2e5   : > { %v1573_v40 = vadd.f32 %v2694_v45, %v1560_v13 }
 0x2e6   : > { %v1535_v42 = vmul.f32 %v2172_v33, %v1534_v11 }
 0x2e7   : > { %v1611_v12 = vmul.f32 %v2474_v48, %v1573_v40 }
 0x2e8   : > { %v1539_v53 = vsel %vm1538_vm15, %v2172_v33, %v1535_v42 }
 0x2e9   : > { %1620 = vst [vmem:[%s2704_s28 + $0x38] sm:$0xff] %v1611_v12  ;;  %v1548_v28 = vmul.f32 %v1539_v53, %v2681_v52 }
 0x2eb   : > { %v1561_v25 = vmul.f32 %v2689_v17, %v1548_v28 }
 0x2ed   : > { %v1574_v21 = vadd.f32 %v2694_v45, %v1561_v25 }
 0x2ef   : > { %v1612_v39 = vmul.f32 %v2480_v56, %v1574_v21 }
 0x2f1   : > { %1621 = vst [vmem:[%s2704_s28 + $0x40] sm:$0xff] %v1612_v39 }
 0x2f2   : > { %2230 = shalt.err (!%p2227_p9)
}
 0x2f3   : > { %s2292_s15 = smov 128   ;;  %s2293_s28 = smov 8  }
 0x2f4   : > { %2080 = dma.vmem_to_hbm [thread:$0]  (%p2384_p4), %s1638_s23, 1152, %s1640_s12, %s1623_s24, %s2292_s15, %s2292_s15, %s2293_s28  }
 0x2f5 PF: > { %p2092_p10 = scmp.ge.s32.totalorder %s2285_s14, 2  ;;  %s1654_s27 = sand.u32 1, %s2265_s30  }
 0x2f6   : > { %s1655_s29 = scalar_lea.sflag [#allocation4], %s1654_s27 }
 0x2f7   : > { %p2087_p11 = pnand %p2092_p10, %p2391_p8 }
 0x2f9   : > { %p2088_p12 = pneg %p2087_p11 }
 0x2fb   : > { %2260 = dma.done.wait (%p2088_p12), %s1655_s29, 1152  }
 0x2fc   : > { %2262 = vsyncadd (%p2088_p12), %s1655_s29, 4294966144  ;;  %s23_s14 = sadd.s32 1, %s2285_s14   ;;  %s2807_s30 = smov %s2269_s10 }
 0x2fd   : > { %p20_p13 = scmp.ge.s32.totalorder %s23_s14, 4   ;;  %s2808_s10 = smov %s2273_s11 }
 0x2fe   : > { %s2809_s11 = smov %s2397_s22  ;;  %s2810_s12 = smov %s2281_s13 }
 0x2ff   : > { %s2811_s13 = smov %s2813_s17  ;;  %22 = sbr.rel (!%p20_p13) target bundleno = 5 (0x5), region = 106 }
 0x304   :  { %1661 = vsyncpa [#allocation3], 1 }
 0x305   :  { %1663 = vsyncpa [#allocation3 + $0x1], 1 }
 0x306   :  { %1664 = vsyncpa [#allocation4], 1 }
 0x307   :  { %1666 = vsyncpa [#allocation4 + $0x1], 1 }

// kernel: tpu_custom_call.1
= control target key start
LH: loop header
LB: loop body
LE: loop exit
PB: predicated region body
PF: predicated region fallthrough
CT: control target
= control target key end

     0   :  { %14 = vsyncpa [#allocation3], 0  ;;  %s2795_s0 = inlined_call_operand.vmem [shape: bf16[2,1,76,128], index: 0, kind: input, shape index: {}]   ;;  %s2796_s1 = inlined_call_operand.vmem [shape: f32[2,1,72,128], index: 1, kind: input, shape index: {}]   ;;  %s2797_s2 = inlined_call_operand.vmem [shape: f32[2,1,76,1], index: 2, kind: input, shape index: {}]   ;;  %s2798_s3 = inlined_call_operand.vmem [shape: bf16[128,128], index: 3, kind: input, shape index: {}]   ;;  %s2799_s4 = inlined_call_operand.vmem [shape: f32[1,128], index: 4, kind: input, shape index: {}]   ;;  %s2800_s5 = inlined_call_operand.hbm [shape: bf16[5,128,128], index: 5, kind: input, shape index: {}]   ;;  %s2801_s6 = inlined_call_operand.vmem [shape: f32[1,128], index: 6, kind: input, shape index: {}]   ;;  %s2802_s7 = inlined_call_operand.vmem [shape: f32[1,128], index: 7, kind: input, shape index: {}]   ;;  %s2803_s8 = inlined_call_operand.vmem [shape: f32[1,128], index: 8, kind: input, shape index: {}]   ;;  %s2804_s9 = inlined_call_operand.hbm [shape: f32[2,72,128], index: 9, kind: output, shape index: {}]  }
   0x1   :  { %15 = vsyncpa [#allocation4], 0 }
   0x2   :  { %17 = vsyncpa [#allocation4 + $0x1], 0  ;;  %s2344_s30 = smov 0   ;;  %s2346_s10 = smov 0  }
   0x3   :  { %s2348_s11 = smov 0   ;;  %s2350_s12 = smov 0  }
   0x4   :  { %s2352_s13 = smov 0   ;;  %s2354_s14 = smov 0  }
   0x5 LB: > { %s1776_s15 = sadd.s32 4294967295, %s2285_s14   ;;  %s1777_s16 = sadd.s32 4294967294, %s2285_s14   ;;  %s2285_s14 = sphi %s2354_s14, %s23_s14   ;;  %s2281_s13 = sphi %s2352_s13, %s2811_s13   ;;  %s2277_s12 = sphi %s2350_s12, %s2810_s12   ;;  %s2273_s11 = sphi %s2348_s11, %s2809_s11   ;;  %s2269_s10 = sphi %s2346_s10, %s2808_s10   ;;  %s2265_s30 = sphi %s2344_s30, %s2807_s30  }
   0x6   : > { %s35_s17 = sadd.s32 1, %s2281_s13  ;;  %s254_s18 = sadd.s32 1, %s2273_s11 }
   0x7   : > { %p37_p0 = scmp.ge.s32.totalorder %s35_s17, 2  ;;  %p264_p1 = scmp.ne.s32.totalorder %s2273_s11, %s2269_s10 }
   0x8   : > { %p265_p2 = scmp.eq.s32.totalorder %s1776_s15, 1  ;;  %p270_p3 = scmp.ne.s32.totalorder %s2269_s10, %s2265_s30 }
   0x9   : > { %s2813_s17 = smov (%p37_p0, %s35_s17), 0  ;;  %p271_p5 = scmp.eq.s32.totalorder %s1777_s16, 1 }
   0xa   : > { %p2384_p4 = por %p265_p2, %p264_p1  ;;  %s249_s20 = ssub.s32 %s2281_s13, %s2813_s17 }
   0xb   : > { %p1778_p6 = scmp.ge.s32.totalorder %s2285_s14, 1  ;;  %p252_p7 = scmp.eq.s32.totalorder %s249_s20, 0 }
   0xc   : > { %p2391_p8 = por %p271_p5, %p270_p3  ;;  %p278_p9 = scmp.lt.s32.totalorder %s2285_s14, 3 }
   0xd   : > { %s2397_s22 = scalar_select %p252_p7, %s2273_s11, %s254_s18  }
   0xe   : > { %p279_p10 = pnand %p1778_p6, %p278_p9  ;;  %p2090_p11 = scmp.eq.s32.totalorder %s1776_s15, 0 }
   0xf   : > { %s295_s25 = sshll.u32 %s2800_s5, 4  ;;  %s2287_s26 = smov [#allocation2]   ;;  %s296_s25 = int_to_ptr.hbm [resolvable:$true] %s295_s25 }
  0x10   : > { %p2082_p12 = pneg %p279_p10  ;;  %s297_s27 = sshll.u32 %s2287_s26, 4  ;;  %s298_s27 = int_to_ptr.vmem [resolvable:$true] %s297_s27 }
  0x11   : > { %s2288_s28 = smov 64   ;;  %s2289_s29 = smov 4  }
  0x12   : > { %p2083_p13 = pnand %p2090_p11, %p2082_p12  ;;  %358 = sbr.rel (%p279_p10) target bundleno = 757 (0x2f5), region = 56 }
  0x14   : > { %2085 = dma.hbm_to_vmem [thread:$0]  (!%p2083_p13), %s296_s25, 5120, %s298_s27, [#allocation3], %s2288_s28, %s2288_s28, %s2289_s29  }
  0x17   : > { %2256 = dma.done.wait (%p2090_p11), [#allocation3], 5120  }
  0x18   : > { %2258 = vsyncadd (%p2090_p11), [#allocation3], 4294962176  ;;  %p417_p0 = scmp.lt.s32.totalorder %s2277_s12, 1  ;;  %v2014_v0 = vld [vmem:[%s2798_s3 + $0x38] sm:$0xff]  ;;  %v2013_v1 = vld [vmem:[%s2798_s3 + $0x30] sm:$0xff]  ;;  %v2290_v2 = vmov 0  }
  0x19   : > { %563 = vmatpush.bf16.msra.mxu0 %v2014_v0  ;;  %2055 = vmatpush.bf16.msra.mxu2 %v2014_v0  ;;  %v2012_v5 = vld [vmem:[%s2798_s3 + $0x28] sm:$0xff]  ;;  %v2011_v8 = vld [vmem:[%s2798_s3 + $0x20] sm:$0xff]  ;;  %v2010_v9 = vld [vmem:[%s2798_s3 + $0x18] sm:$0xff]  ;;  %vm1219_vm0 = vcmask 1045504   ;;  %vm735_vm1 = vsmask.f32 7424 }
  0x1a   : > { %s2404_s15 = scalar_select %p417_p0, %s2277_s12, 1  ;;  %2149 = vset.pattern.permute.xlu1 %v2290_v2  ;;  %2148 = vset.pattern.permute.xlu0 %v2290_v2  ;;  %v2009_v12 = vld [vmem:[%s2798_s3 + $0x10] sm:$0xff]  ;;  %v2008_v13 = vld [vmem:[%s2798_s3 + $0x8] sm:$0xff]  ;;  %v2007_v14 = vld [vmem:[%s2798_s3] sm:$0xff]  ;;  %vm1087_vm2 = vsmask.f32 6400 }
  0x1b   : > { %2150 = vset.pattern.permute.xlu2 %v2290_v2  ;;  %v2022_v19 = vld [vmem:[#allocation2 + $0x38] sm:$0xff]  ;;  %v2021_v20 = vld [vmem:[#allocation2 + $0x30] sm:$0xff]  ;;  %v2020_v28 = vld [vmem:[#allocation2 + $0x28] sm:$0xff]  ;;  %vm965_vm3 = vcmask 1046528  }
  0x1c   : > { %s2074_s16 = smul.u32 80, %s2404_s15  ;;  %v2019_v30 = vld [vmem:[#allocation2 + $0x20] sm:$0xff]  ;;  %v2018_v35 = vld [vmem:[#allocation2 + $0x18] sm:$0xff]  ;;  %v2017_v37 = vld [vmem:[#allocation2 + $0x10] sm:$0xff] }
  0x1d   : > { %564 = vmatpush.bf16.msra.mxu0 %v2013_v1  ;;  %2056 = vmatpush.bf16.msra.mxu2 %v2013_v1  ;;  %s2072_s29 = smul.u32 40, %s2404_s15  ;;  %v2030_v38 = vld [vmem:[#allocation2 + $0x78] sm:$0xff]  ;;  %v2016_v41 = vld [vmem:[#allocation2 + $0x8] sm:$0xff]  ;;  %v2029_v43 = vld [vmem:[#allocation2 + $0x70] sm:$0xff] }
  0x1e   : > { %s2413_s26 = scalar_lea.vmem %s2797_s2, %s2074_s16  ;;  %828 = vmatpush.bf16.msra.mxu1 %v2030_v38  ;;  %v2046_v39 = vld [vmem:[#allocation2 + $0xf8] sm:$0xff]  ;;  %2063 = vmatpush.bf16.msra.mxu3 %v2030_v38  ;;  %v2045_v46 = vld [vmem:[#allocation2 + $0xf0] sm:$0xff]  ;;  %v2015_v47 = vld [vmem:[#allocation2] sm:$0xff]  ;;  %s2073_s27 = smul.u32 72, %s2404_s15 }
  0x1f   : > { %v451_v3 = vld [vmem:[%s2413_s26 + $0x30] sm:$0xff]  ;;  %v449_v4 = vld [vmem:[%s2413_s26 + $0x20] sm:$0xff]  ;;  %v452_v6 = vld [vmem:[%s2413_s26 + $0x38] sm:$0xff]  ;;  %s425_s24 = scalar_lea.vmem %s2795_s0, %s2072_s29  ;;  %s414_s15 = sand.u32 1, %s2269_s10  }
  0x20   : > { %639 = vperm.xlu1 %2149, %v451_v3   ;;  %629 = vperm.xlu0 %2148, %v449_v4   ;;  %v450_v7 = vld [vmem:[%s2413_s26 + $0x28] sm:$0xff]  ;;  %v445_v11 = vld [vmem:[%s2413_s26] sm:$0xff]  ;;  %v2004_v16 = vld [vmem:[%s425_s24 + $0x10] sm:$0xff]  ;;  %s2588_s16 = scalar_lea.vmem %s2796_s1, %s2073_s27  ;;  %s2071_s27 = smul.u32 72, %s414_s15 }
  0x21   : > { %565 = vmatpush.bf16.msra.mxu0 %v2012_v5  ;;  %2057 = vmatpush.bf16.msra.mxu2 %v2012_v5  ;;  %v446_v10 = vld [vmem:[%s2413_s26 + $0x8] sm:$0xff]  ;;  %v2002_v15 = vld [vmem:[%s425_s24] sm:$0xff]  ;;  %v448_v17 = vld [vmem:[%s2413_s26 + $0x18] sm:$0xff]  ;;  %s2075_s29 = smul.u32 72, %s2277_s12 }
  0x22   : > { %v453_v18 = vld [vmem:[%s2413_s26 + $0x40] sm:$0xff]  ;;  %v454_v21 = vld [vmem:[%s2413_s26 + $0x48] sm:$0xf]  ;;  %v2005_v23 = vld [vmem:[%s425_s24 + $0x18] sm:$0xff]  ;;  %829 = vmatpush.bf16.msra.mxu1 %v2029_v43  ;;  %2064 = vmatpush.bf16.msra.mxu3 %v2029_v43  ;;  %s2704_s28 = scalar_lea.vmem [#allocation5], %s2071_s27 }
  0x23   : > { %649 = vperm.xlu2 %2150, %v453_v18   ;;  %v2003_v22 = vld [vmem:[%s425_s24 + $0x8] sm:$0xff]  ;;  %v447_v24 = vld [vmem:[%s2413_s26 + $0x10] sm:$0xff]  ;;  %v1804_v25 = vld [vmem:[%s425_s24 + $0x20] sm:$0xf]  ;;  %s1636_s20 = scalar_lea.hbm %s2804_s9, %s2075_s29  ;;  %s1637_s23 = sshll.u32 %s2704_s28, 4  ;;  %s1638_s23 = int_to_ptr.vmem [resolvable:$true] %s1637_s23 }
  0x24   : > { %v2006_v26 = vld [vmem:[%s425_s24 + $0x20] sm:$0x30]  ;;  %v2028_v49 = vld [vmem:[#allocation2 + $0x68] sm:$0xff]  ;;  %v2026_v55 = vld [vmem:[#allocation2 + $0x58] sm:$0xff]  ;;  %s1639_s12 = sshll.u32 %s1636_s20, 4  ;;  %s1623_s24 = scalar_lea.sflag [#allocation4], %s414_s15  ;;  %s1640_s12 = int_to_ptr.hbm [resolvable:$true] %s1639_s12 }
  0x25   : > { %566 = vmatpush.bf16.msra.mxu0 %v2011_v8  ;;  %2058 = vmatpush.bf16.msra.mxu2 %v2011_v8  ;;  %v1805_v27 = vor.u32 %v2006_v26, %v1804_v25  ;;  %v2044_v50 = vld [vmem:[#allocation2 + $0xe8] sm:$0xff]  ;;  %v2027_v51 = vld [vmem:[#allocation2 + $0x60] sm:$0xff]  ;;  %v2042_v57 = vld [vmem:[#allocation2 + $0xd8] sm:$0xff]  ;;  %s2217_s26 = sshra.s32 %s1640_s12, 4  ;;  %s2218_s26 = int_to_ptr.hbm [resolvable:$true] %s2217_s26 }
  0x26   : > { %830 = vmatpush.bf16.msra.mxu1 %v2028_v49  ;;  %2065 = vmatpush.bf16.msra.mxu3 %v2028_v49  ;;  %v2043_v52 = vld [vmem:[#allocation2 + $0xe0] sm:$0xff]  ;;  %v2025_v58 = vld [vmem:[#allocation2 + $0x50] sm:$0xff]  ;;  %v2024_v63 = vld [vmem:[#allocation2 + $0x48] sm:$0xff]  ;;  %s2219_s25 = scalar_lea.hbm %s2218_s26, 72  ;;  %p2224_p5 = scmp.lt.s32.totalorder %s2218_s26, %s2804_s9 }
  0x27   : > { %v2485_v59 = vld [vmem:[%s2799_s4] ss:$0 sm:$0xff]  ;;  %v2041_v60 = vld [vmem:[#allocation2 + $0xd0] sm:$0xff]  ;;  %v2040_v1 = vld [vmem:[#allocation2 + $0xc8] sm:$0xff]  ;;  %p2220_p1 = scmp.ne.s32.totalorder %s2218_s26, %s2219_s25 }
  0x28   : > { %644 = vperm.xlu1 %2149, %v452_v6   ;;  %634 = vperm.xlu0 %2148, %v450_v7   ;;  %v2023_v3 = vld [vmem:[#allocation2 + $0x40] sm:$0xff] }
  0x29   : > { %567 = vmatpush.bf16.msra.mxu0 %v2010_v9  ;;  %2059 = vmatpush.bf16.msra.mxu2 %v2010_v9  ;;  %v2039_v6 = vld [vmem:[#allocation2 + $0xc0] sm:$0xff]  ;;  %v2054_v9 = vld [vmem:[#allocation2 + $0x138] sm:$0xff]  ;;  %p2221_p2 = pnand %p2220_p1, %p2384_p4 }
  0x2a   : > { %831 = vmatpush.bf16.msra.mxu1 %v2027_v51  ;;  %2066 = vmatpush.bf16.msra.mxu3 %v2027_v51 }
  0x2b   : > { %654 = vperm.xlu2 %2150, %v454_v21   ;;  %p2222_p3 = pneg %p2221_p2 }
  0x2d   : > { %568 = vmatpush.bf16.msra.mxu0 %v2009_v12  ;;  %2060 = vmatpush.bf16.msra.mxu2 %v2009_v12 }
  0x2e   : > { %832 = vmatpush.bf16.msra.mxu1 %v2026_v55  ;;  %2067 = vmatpush.bf16.msra.mxu3 %v2026_v55  ;;  %v2037_v55 = vld [vmem:[#allocation2 + $0xb0] sm:$0xff] }
  0x30   : > { %614 = vperm.xlu1 %2149, %v446_v10   ;;  %609 = vperm.xlu0 %2148, %v445_v11  }
  0x31   : > { %569 = vmatpush.bf16.msra.mxu0 %v2008_v13  ;;  %2061 = vmatpush.bf16.msra.mxu2 %v2008_v13 }
  0x32   : > { %833 = vmatpush.bf16.msra.mxu1 %v2025_v58  ;;  %2068 = vmatpush.bf16.msra.mxu3 %v2025_v58 }
  0x33   : > { %619 = vperm.xlu2 %2150, %v447_v24   ;;  %v2052_v24 = vld [vmem:[#allocation2 + $0x128] sm:$0xff] }
  0x35   : > { %570 = vmatpush.bf16.msra.mxu0 %v2007_v14  ;;  %2062 = vmatpush.bf16.msra.mxu2 %v2007_v14 }
  0x36   : > { %834 = vmatpush.bf16.msra.mxu1 %v2024_v63  ;;  %2069 = vmatpush.bf16.msra.mxu3 %v2024_v63 }
  0x38   : > { %571 = vmatmul.bf16.vlgmr.msra.gmra.mxu0 %v2002_v15  ;;  %581 = vmatmul.bf16.vlgmr.msra.gmra.mxu2 %v2004_v16  ;;  %v2053_v15 = vld [vmem:[#allocation2 + $0x130] sm:$0xff] }
  0x39   : > { %624 = vperm.xlu0 %2148, %v448_v17   ;;  %915 = vmatpush.bf16.msrb.mxu2 %v2022_v19 }
  0x3a   : > { %1160 = vmatpush.bf16.msrb.mxu0 %v2046_v39  ;;  %835 = vmatpush.bf16.msra.mxu1 %v2023_v3 }
  0x3b   : > { %2070 = vmatpush.bf16.msra.mxu3 %v2023_v3 }
  0x3d   : > { %916 = vmatpush.bf16.msrb.mxu2 %v2021_v20 }
  0x3e   : > { %1161 = vmatpush.bf16.msrb.mxu0 %v2045_v46  ;;  %1282 = vmatpush.bf16.msrb.mxu1 %v2054_v9 }
  0x41   : > { %917 = vmatpush.bf16.msrb.mxu2 %v2020_v28 }
  0x42   : > { %1162 = vmatpush.bf16.msrb.mxu0 %v2044_v50  ;;  %1283 = vmatpush.bf16.msrb.mxu1 %v2053_v15  ;;  %v2050_v50 = vld [vmem:[#allocation2 + $0x118] sm:$0xff] }
  0x45   : > { %918 = vmatpush.bf16.msrb.mxu2 %v2019_v30 }
  0x46   : > { %1163 = vmatpush.bf16.msrb.mxu0 %v2043_v52  ;;  %1284 = vmatpush.bf16.msrb.mxu1 %v2052_v24 }
  0x48   : > { %576 = vmatmul.bf16.gmra.mxu0 %v2003_v22  ;;  %586 = vmatmul.bf16.gmra.mxu2 %v2005_v23 }
  0x49   : > { %919 = vmatpush.bf16.msrb.mxu2 %v2018_v35 }
  0x4a   : > { %1164 = vmatpush.bf16.msrb.mxu0 %v2042_v57 }
  0x4d   : > { %920 = vmatpush.bf16.msrb.mxu2 %v2017_v37  ;;  %v2051_v37 = vld [vmem:[#allocation2 + $0x120] sm:$0xff] }
  0x4e   : > { %1165 = vmatpush.bf16.msrb.mxu0 %v2041_v60  ;;  %1285 = vmatpush.bf16.msrb.mxu1 %v2051_v37 }
  0x51   : > { %921 = vmatpush.bf16.msrb.mxu2 %v2016_v41 }
  0x52   : > { %1166 = vmatpush.bf16.msrb.mxu0 %v2040_v1  ;;  %1286 = vmatpush.bf16.msrb.mxu1 %v2050_v50 }
  0x55   : > { %922 = vmatpush.bf16.msrb.mxu2 %v2015_v47  ;;  %v2038_v47 = vld [vmem:[#allocation2 + $0xb8] sm:$0xff] }
  0x56   : > { %1167 = vmatpush.bf16.msrb.mxu0 %v2039_v6  ;;  %1028 = vmatpush.bf16.msrb.mxu3 %v2038_v47  ;;  %v2036_v6 = vld [vmem:[#allocation2 + $0xa8] sm:$0xff] }
  0x58   : > { %591 = vmatmul.bf16.gmra.mxu2 %v1805_v27 }
  0x5a   : > { %1029 = vmatpush.bf16.msrb.mxu3 %v2037_v55 }
  0x5e   : > { %1030 = vmatpush.bf16.msrb.mxu3 %v2036_v6  ;;  %v2032_v6 = vld [vmem:[#allocation2 + $0x88] sm:$0xff] }
  0x7d   : > { %v2468_v44 = vpop.permute.xlu2 %649 }
  0x7e   : > { %v1591_v45 = vrot.slane %v2468_v44, 2 }
  0x85   : > { %v2476_v53 = vpop.permute.xlu2 %654 }
  0x86   : > { %v1593_v54 = vrot.slane %v2476_v53, 2 }
  0x88   : > { %v2480_v56 = vsel %vm1219_vm0, %v1591_v45, %v1593_v54 }
  0x8d   : > { %v2502_v35 = vpop.permute.xlu2 %619 }
  0x92   : > { %v2450_v29 = vpop.permute.xlu0 %629  ;;  %v2452_v31 = vpop.permute.xlu1 %639 }
  0x93   : > { %v1583_v32 = vrot.slane %v2450_v29, 2 }
  0x9a   : > { %v2455_v33 = vpop.permute.xlu0 %634  ;;  %v2465_v40 = vpop.permute.xlu1 %644 }
  0x9b   : > { %v1585_v34 = vrot.slane %v2455_v33, 2  ;;  %v1589_v42 = vrot.slane %v2465_v40, 2 }
  0x9d   : > { %v2463_v36 = vsel %vm1219_vm0, %v1583_v32, %v1585_v34  ;;  %v2474_v48 = vsel %vm1219_vm0, %v1589_v42, %v1591_v45 }
  0xa2   : > { %v2488_v2 = vpop.permute.xlu0 %609  ;;  %v2492_v10 = vpop.permute.xlu1 %614 }
  0xab   : > { %v2508_v57 = vpop.permute.xlu0 %624 }
  0xb5   : > { %v572_v61 = vpop.f32.mrf.mxu0 }
  0xb6   : > { %v573_v62 = vadd.f32 %v2485_v59, %v572_v61  ;;  %v2049_v61 = vld [vmem:[#allocation2 + $0x110] sm:$0xff] }
  0xb7   : > { %1287 = vmatpush.bf16.msrb.mxu1 %v2049_v61 }
  0xb8   : > { %v597_v0 = vmax.f32 %v573_v62, 0.0 }
  0xba   : > { %v657_v5 = vmul.f32 %v2488_v2, %v597_v0 }
  0xbb   : > { %v582_v4 = vpop.f32.mrf.mxu2 }
  0xbc   : > { %v667_v12 = vpack.c.bf16 %v657_v5, %v657_v5  ;;  %v583_v16 = vadd.f32 %v2485_v59, %v582_v4 }
  0xbd   : > { %v574_v7 = vpop.f32.mrf.mxu0 }
  0xbe   : > { %v575_v8 = vadd.f32 %v2485_v59, %v574_v7  ;;  %v720_v18 = vunpack.c.l.b16 %v667_v12  ;;  %v601_v25 = vmax.f32 %v583_v16, 0.0  ;;  %v2048_v7 = vld [vmem:[#allocation2 + $0x108] sm:$0xff] }
  0xbf   : > { %1288 = vmatpush.bf16.msrb.mxu1 %v2048_v7 }
  0xc0   : > { %v598_v11 = vmax.f32 %v575_v8, 0.0  ;;  %v661_v38 = vmul.f32 %v2450_v29, %v601_v25 }
  0xc2   : > { %v658_v13 = vmul.f32 %v2492_v10, %v598_v11  ;;  %v671_v51 = vpack.c.bf16 %v661_v38, %v661_v38 }
  0xc3   : > { %v584_v14 = vpop.f32.mrf.mxu2 }
  0xc4   : > { %v668_v17 = vpack.c.bf16 %v658_v13, %v658_v13  ;;  %v585_v19 = vadd.f32 %v2485_v59, %v584_v14  ;;  %v724_v1 = vunpack.c.l.b16 %v671_v51 }
  0xc5   : > { %v577_v20 = vpop.f32.mrf.mxu0 }
  0xc6   : > { %v721_v21 = vunpack.c.l.b16 %v668_v17  ;;  %v602_v22 = vmax.f32 %v585_v19, 0.0  ;;  %v578_v23 = vadd.f32 %v2485_v59, %v577_v20  ;;  %v2035_v17 = vld [vmem:[#allocation2 + $0xa0] sm:$0xff] }
  0xc7   : > { %1031 = vmatpush.bf16.msrb.mxu3 %v2035_v17 }
  0xc8   : > { %v2498_v26 = vpack.c.b16 %v721_v21, %v720_v18  ;;  %v599_v27 = vmax.f32 %v578_v23, 0.0  ;;  %v662_v28 = vmul.f32 %v2455_v33, %v602_v22  ;;  %v2047_v22 = vld [vmem:[#allocation2 + $0x100] sm:$0xff] }
  0xc9   : > { %1289 = vmatpush.bf16.msrb.mxu1 %v2047_v22 }
  0xca   : > { %923 = vmatmul.bf16.vlgmr.msrb.gmra.mxu2 %v2498_v26  ;;  %v659_v41 = vmul.f32 %v2502_v35, %v599_v27  ;;  %v672_v45 = vpack.c.bf16 %v662_v28, %v662_v28  ;;  %v739_v0 = vshll.u32 %v2498_v26, 16  ;;  %v737_v13 = vshrl.u32 %v2498_v26, 16 }
  0xcb   : > { %v587_v30 = vpop.f32.mrf.mxu2 }
  0xcc   : > { %v588_v39 = vadd.f32 %v2485_v59, %v587_v30  ;;  %v669_v54 = vpack.c.bf16 %v659_v41, %v659_v41  ;;  %v725_v58 = vunpack.c.l.b16 %v672_v45  ;;  %v741_v14 = vrot.slane %v739_v0, 1  ;;  %v2034_v41 = vld [vmem:[#allocation2 + $0x98] sm:$0xff] }
  0xcd   : > { %v579_v43 = vpop.f32.mrf.mxu0  ;;  %v1088_v27 = vrot.slane %v737_v13, 1  ;;  %v1089_v28 = vrot.slane %v739_v0, 2  ;;  %1032 = vmatpush.bf16.msrb.mxu3 %v2034_v41 }
  0xce   : > { %v580_v46 = vadd.f32 %v2485_v59, %v579_v43  ;;  %v603_v49 = vmax.f32 %v588_v39, 0.0  ;;  %v722_v3 = vunpack.c.l.b16 %v669_v54  ;;  %v2514_v8 = vpack.c.b16 %v725_v58, %v724_v1 }
  0xcf   : > { %v742_v25 = vor.u32 %v741_v14, %v737_v13  ;;  %v2031_v14 = vld [vmem:[#allocation2 + $0x80] sm:$0xff] }
  0xd0   : > { %v600_v52 = vmax.f32 %v580_v46, 0.0  ;;  %v663_v62 = vmul.f32 %v2452_v31, %v603_v49  ;;  %v752_v21 = vshll.u32 %v2514_v8, 16  ;;  %v1090_v49 = vor.u32 %v1089_v28, %v1088_v27 }
  0xd1   : > { %v969_v58 = vrot.slane %v2514_v8, 1 }
  0xd2   : > { %v660_v60 = vmul.f32 %v2508_v57, %v600_v52  ;;  %v673_v12 = vpack.c.bf16 %v663_v62, %v663_v62  ;;  %v754_v47 = vrot.slane %v752_v21, 1  ;;  %v756_v52 = vshrl.u32 %v2514_v8, 16 }
  0xd3   : > { %v589_v63 = vpop.f32.mrf.mxu2  ;;  %v1096_v17 = vrot.slane %v752_v21, 2 }
  0xd4   : > { %v670_v4 = vpack.c.bf16 %v660_v60, %v660_v60  ;;  %v590_v5 = vadd.f32 %v2485_v59, %v589_v63  ;;  %v726_v23 = vunpack.c.l.b16 %v673_v12  ;;  %v758_v61 = vor.u32 %v756_v52, %v754_v47  ;;  %v2033_v63 = vld [vmem:[#allocation2 + $0x90] sm:$0xff] }
  0xd5   : > { %1033 = vmatpush.bf16.msrb.mxu3 %v2033_v63  ;;  %v966_v63 = vrot.slane %v2498_v26, 1 }
  0xd6   : > { %v723_v9 = vunpack.c.l.b16 %v670_v4  ;;  %v604_v11 = vmax.f32 %v590_v5, 0.0 }
  0xd8   : > { %v2517_v15 = vpack.c.b16 %v723_v9, %v722_v3  ;;  %v664_v16 = vmul.f32 %v2465_v40, %v604_v11 }
  0xd9   : > { %1034 = vmatpush.bf16.msrb.mxu3 %v2032_v6 }
  0xda   : > { %v674_v18 = vpack.c.bf16 %v664_v16, %v664_v16  ;;  %928 = vmatmul.bf16.gmra.mxu2 %v2517_v15  ;;  %v744_v19 = vshll.u32 %v2517_v15, 16  ;;  %v748_v20 = vshrl.u32 %v2517_v15, 16  ;;  %v1095_v16 = vrot.slane %v756_v52, 1 }
  0xdb   : > { %v592_v24 = vpop.f32.mrf.mxu2 }
  0xdc   : > { %v727_v30 = vunpack.c.l.b16 %v674_v18  ;;  %v593_v37 = vadd.f32 %v2485_v59, %v592_v24  ;;  %v746_v38 = vrot.slane %v744_v19, 1  ;;  %v1091_v39 = vrot.slane %v748_v20, 1 }
  0xdd   : > { %v1092_v43 = vrot.slane %v744_v19, 2  ;;  %1035 = vmatpush.bf16.msrb.mxu3 %v2031_v14  ;;  %v1097_v22 = vor.u32 %v1096_v17, %v1095_v16 }
  0xde   : > { %v2525_v45 = vpack.c.b16 %v727_v30, %v726_v23  ;;  %v747_v46 = vsel %vm735_vm1, %v742_v25, %v746_v38  ;;  %v605_v51 = vmax.f32 %v593_v37, 0.0  ;;  %v750_v13 = vor.u32 %v748_v20, %v746_v38 }
  0xdf   : > { %836 = vmatmul.bf16.vlgmr.msra.gmra.mxu1 %v747_v46  ;;  %v1093_v50 = vor.u32 %v1092_v43, %v1091_v39  ;;  %v1221_v38 = vrot.slane %v2517_v15, 2  ;;  %v1220_v39 = vrot.slane %v2498_v26, 2 }
  0xe0   : > { %v760_v54 = vshll.u32 %v2525_v45, 16  ;;  %v971_v60 = vrot.slane %v2525_v45, 1  ;;  %v665_v3 = vmul.f32 %v2468_v44, %v605_v51  ;;  %v755_v19 = vsel %vm735_vm1, %v750_v13, %v754_v47 }
  0xe1   : > { %v1094_v55 = vsel %vm1087_vm2, %v1090_v49, %v1093_v50  ;;  %v764_v23 = vshrl.u32 %v2525_v45, 16  ;;  %v1098_v25 = vsel %vm1087_vm2, %v1093_v50, %v1097_v22  ;;  %v1222_v43 = vsel %vm1219_vm0, %v1220_v39, %v1221_v38 }
  0xe2   : > { %1168 = vmatmul.bf16.vlgmr.msrb.gmra.mxu0 %v1094_v55  ;;  %v762_v62 = vrot.slane %v760_v54, 1  ;;  %v2536_v1 = vsel %vm965_vm3, %v969_v58, %v971_v60  ;;  %v675_v9 = vpack.c.bf16 %v665_v3, %v665_v3  ;;  %v1100_v37 = vrot.slane %v760_v54, 2 }
  0xe3   : > { %v594_v0 = vpop.f32.mrf.mxu2  ;;  %v1099_v30 = vrot.slane %v764_v23, 1  ;;  %v1223_v54 = vrot.slane %v2514_v8, 2  ;;  %v1225_v3 = vrot.slane %v2525_v45, 2 }
  0xe4   : > { %v595_v4 = vadd.f32 %v2485_v59, %v594_v0  ;;  %v763_v5 = vsel %vm735_vm1, %v758_v61, %v762_v62  ;;  %v728_v44 = vunpack.c.l.b16 %v675_v9  ;;  %v766_v27 = vor.u32 %v764_v23, %v762_v62 }
  0xe5   : > { %846 = vmatmul.bf16.vlgmr.msra.gmra.mxu3 %v763_v5  ;;  %v1101_v41 = vor.u32 %v1100_v37, %v1099_v30  ;;  %v967_v61 = vrot.slane %v2517_v15, 1 }
  0xe6   : > { %v606_v7 = vmax.f32 %v595_v4, 0.0  ;;  %v861_v50 = vpack.c.b16 %v728_v44, %v728_v44  ;;  %v1226_v4 = vsel %vm1219_vm0, %v1223_v54, %v1225_v3 }
  0xe7   : > { %v1102_v46 = vsel %vm1087_vm2, %v1097_v22, %v1101_v41  ;;  %v968_v0 = vsel %vm965_vm3, %v966_v63, %v967_v61  ;;  %v970_v5 = vsel %vm965_vm3, %v967_v61, %v969_v58  ;;  %v2593_v61 = vld [vmem:[%s2801_s6] ss:$0 sm:$0xff] }
  0xe8   : > { %v666_v11 = vmul.f32 %v2476_v53, %v606_v7 }
  0xea   : > { %v676_v12 = vpack.c.bf16 %v666_v11, %v666_v11  ;;  %933 = vmatmul.bf16.gmra.mxu2 %v2514_v8 }
  0xec   : > { %v729_v18 = vunpack.c.l.b16 %v676_v12 }
  0xee   : > { %v734_v59 = vpack.c.b16 %v729_v18, %v728_v44 }
  0xef   : > { %841 = vmatmul.bf16.gmra.mxu1 %v755_v19 }
  0xf0   : > { %v768_v24 = vshll.u32 %v734_v59, 16  ;;  %v973_v53 = vrot.slane %v734_v59, 1  ;;  %v772_v47 = vshrl.u32 %v734_v59, 16  ;;  %v1227_v15 = vrot.slane %v734_v59, 2 }
  0xf2   : > { %1173 = vmatmul.bf16.gmra.mxu0 %v1098_v25  ;;  %v770_v20 = vrot.slane %v768_v24, 1  ;;  %v974_v28 = vsel %vm965_vm3, %v971_v60, %v973_v53  ;;  %v1103_v51 = vrot.slane %v772_v47, 1  ;;  %v1104_v52 = vrot.slane %v768_v24, 2 }
  0xf3   : > { %v1224_v60 = vsel %vm1219_vm0, %v1221_v38, %v1223_v54  ;;  %v1228_v6 = vsel %vm1219_vm0, %v1225_v3, %v1227_v15 }
  0xf4   : > { %v771_v21 = vsel %vm735_vm1, %v766_v27, %v770_v20  ;;  %v774_v49 = vor.u32 %v772_v47, %v770_v20  ;;  %v1105_v55 = vor.u32 %v1104_v52, %v1103_v51 }
  0xf5   : > { %851 = vmatmul.bf16.gmra.mxu3 %v771_v21 }
  0xf6   : > { %v1106_v62 = vsel %vm1087_vm2, %v1101_v41, %v1105_v55 }
  0xfa   : > { %938 = vmatmul.bf16.gmra.mxu2 %v2525_v45 }
  0xff   : > { %1290 = vmatmul.bf16.vlgmr.msrb.gmra.mxu1 %v1222_v43 }
 0x102   : > { %1178 = vmatmul.bf16.gmra.mxu0 %v1102_v46 }
 0x105   : > { %856 = vmatmul.bf16.gmra.mxu3 %v774_v49 }
 0x10a   : > { %943 = vmatmul.bf16.gmra.mxu2 %v861_v50 }
 0x10f   : > { %1295 = vmatmul.bf16.gmra.mxu1 %v1224_v60 }
 0x112   : > { %1183 = vmatmul.bf16.gmra.mxu0 %v1106_v62 }
 0x115   : > { %1036 = vmatmul.bf16.vlgmr.msrb.gmra.mxu3 %v968_v0  ;;  %v1337_v0 = vld [vmem:[%s2588_s16] sm:$0xff] }
 0x11f   : > { %1300 = vmatmul.bf16.gmra.mxu1 %v1226_v4 }
 0x122   : > { %1188 = vmatmul.bf16.gmra.mxu0 %v1105_v55 }
 0x125   : > { %1041 = vmatmul.bf16.gmra.mxu3 %v970_v5 }
 0x12f   : > { %1305 = vmatmul.bf16.gmra.mxu1 %v1228_v6 }
 0x135   : > { %1046 = vmatmul.bf16.gmra.mxu3 %v2536_v1 }
 0x13f   : > { %1310 = vmatmul.bf16.gmra.mxu1 %v1227_v15 }
 0x145   : > { %1051 = vmatmul.bf16.gmra.mxu3 %v974_v28 }
 0x14d   : > { %v924_v26 = vpop.f32.mrf.mxu2 }
 0x155   : > { %v926_v7 = vpop.f32.mrf.mxu2  ;;  %1056 = vmatmul.bf16.gmra.mxu3 %v973_v53 }
 0x15c   : > { %v837_v45 = vpop.f32.mrf.mxu1 }
 0x15d   : > { %v929_v9 = vpop.f32.mrf.mxu2  ;;  %v925_v51 = vadd.f32 %v924_v26, %v837_v45 }
 0x15f   : > { %v1169_v11 = vpop.f32.mrf.mxu0 }
 0x164   : > { %v839_v12 = vpop.f32.mrf.mxu1 }
 0x165   : > { %v2566_v13 = vpop.f32.mrf.mxu2  ;;  %v927_v3 = vadd.f32 %v926_v7, %v839_v12 }
 0x167   : > { %v1171_v8 = vpop.f32.mrf.mxu0 }
 0x168   : > { %v847_v58 = vpop.f32.mrf.mxu3 }
 0x16c   : > { %v842_v14 = vpop.f32.mrf.mxu1 }
 0x16d   : > { %v934_v16 = vpop.f32.mrf.mxu2 }
 0x16e   : > { %v2568_v17 = vadd.f32 %v934_v16, %v847_v58  ;;  %v1338_v16 = vld [vmem:[%s2588_s16 + $0x8] sm:$0xff] }
 0x16f   : > { %v1174_v44 = vpop.f32.mrf.mxu0 }
 0x170   : > { %v849_v18 = vpop.f32.mrf.mxu3 }
 0x174   : > { %v844_v1 = vpop.f32.mrf.mxu1 }
 0x175   : > { %v936_v59 = vpop.f32.mrf.mxu2 }
 0x176   : > { %v2570_v19 = vadd.f32 %v936_v59, %v849_v18  ;;  %v930_v18 = vadd.f32 %v929_v9, %v842_v14 }
 0x177   : > { %v1176_v22 = vpop.f32.mrf.mxu0 }
 0x178   : > { %v852_v23 = vpop.f32.mrf.mxu3 }
 0x17c   : > { %v1291_v24 = vpop.f32.mrf.mxu1 }
 0x17d   : > { %v939_v53 = vpop.f32.mrf.mxu2 }
 0x17e   : > { %v2572_v25 = vadd.f32 %v939_v53, %v852_v23 }
 0x17f   : > { %v1179_v27 = vpop.f32.mrf.mxu0 }
 0x180   : > { %v854_v20 = vpop.f32.mrf.mxu3 }
 0x184   : > { %v1293_v28 = vpop.f32.mrf.mxu1 }
 0x185   : > { %v941_v21 = vpop.f32.mrf.mxu2 }
 0x186   : > { %v2574_v30 = vadd.f32 %v941_v21, %v854_v20 }
 0x187   : > { %v2576_v37 = vpop.f32.mrf.mxu0 }
 0x188   : > { %v857_v38 = vpop.f32.mrf.mxu3 }
 0x18c   : > { %v1296_v39 = vpop.f32.mrf.mxu1 }
 0x18d   : > { %v944_v41 = vpop.f32.mrf.mxu2 }
 0x18e   : > { %v2578_v43 = vadd.f32 %v944_v41, %v857_v38  ;;  %v932_v38 = vadd.f32 %v2566_v13, %v844_v1 }
 0x18f   : > { %v2580_v46 = vpop.f32.mrf.mxu0 }
 0x190   : > { %v859_v47 = vpop.f32.mrf.mxu3 }
 0x194   : > { %v1298_v49 = vpop.f32.mrf.mxu1 }
 0x195   : > { %v946_v50 = vpop.f32.mrf.mxu2 }
 0x197   : > { %v2582_v52 = vpop.f32.mrf.mxu0 }
 0x198   : > { %v1037_v54 = vpop.f32.mrf.mxu3 }
 0x199   : > { %v1061_v55 = vadd.f32 %v1037_v54, %v925_v51 }
 0x19b   : > { %v1193_v60 = vadd.f32 %v1169_v11, %v1061_v55 }
 0x19c   : > { %v1301_v62 = vpop.f32.mrf.mxu1 }
 0x19d   : > { %v1315_v63 = vadd.f32 %v1291_v24, %v1193_v60 }
 0x19f   : > { %v2596_v4 = vpop.f32.mrf.mxu0  ;;  %v1328_v5 = vadd.f32 %v2593_v61, %v1315_v63 }
 0x1a0   : > { %v1039_v15 = vpop.f32.mrf.mxu3 }
 0x1a1   : > { %v1062_v6 = vadd.f32 %v1039_v15, %v927_v3  ;;  %v2599_v26 = vadd.f32 %v1337_v0, %v1328_v5  ;;  %v1341_v0 = vld [vmem:[%s2588_s16 + $0x20] sm:$0xff] }
 0x1a3   : > { %v1194_v45 = vadd.f32 %v1171_v8, %v1062_v6  ;;  %1355 = vadd.xlane.f32.xlu1 %v2599_v26  ;;  %v1339_v8 = vld [vmem:[%s2588_s16 + $0x10] sm:$0xff] }
 0x1a4   : > { %v1303_v11 = vpop.f32.mrf.mxu1 }
 0x1a5   : > { %v1316_v58 = vadd.f32 %v1293_v28, %v1194_v45 }
 0x1a7   : > { %v1191_v59 = vpop.f32.mrf.mxu0  ;;  %v1329_v23 = vadd.f32 %v2593_v61, %v1316_v58 }
 0x1a8   : > { %v1042_v7 = vpop.f32.mrf.mxu3  ;;  %v1343_v59 = vld [vmem:[%s2588_s16 + $0x30] sm:$0xff] }
 0x1a9   : > { %v1063_v12 = vadd.f32 %v1042_v7, %v930_v18  ;;  %v2604_v24 = vadd.f32 %v1338_v16, %v1329_v23 }
 0x1ab   : > { %v1195_v53 = vadd.f32 %v1174_v44, %v1063_v12  ;;  %1357 = vadd.xlane.f32.xlu2 %v2604_v24  ;;  %v1340_v44 = vld [vmem:[%s2588_s16 + $0x18] sm:$0xff] }
 0x1ac   : > { %v1306_v20 = vpop.f32.mrf.mxu1 }
 0x1ad   : > { %v1317_v21 = vadd.f32 %v1296_v39, %v1195_v53 }
 0x1af   : > { %v1330_v28 = vadd.f32 %v2593_v61, %v1317_v21 }
 0x1b0   : > { %v1044_v41 = vpop.f32.mrf.mxu3 }
 0x1b1   : > { %v1064_v9 = vadd.f32 %v1044_v41, %v932_v38  ;;  %v2610_v14 = vadd.f32 %v1339_v8, %v1330_v28  ;;  %v1345_v41 = vld [vmem:[%s2588_s16 + $0x40] sm:$0xff] }
 0x1b3   : > { %v1196_v47 = vadd.f32 %v1176_v22, %v1064_v9  ;;  %1359 = vadd.xlane.f32.xlu0 %v2610_v14 }
 0x1b4   : > { %v1308_v50 = vpop.f32.mrf.mxu1 }
 0x1b5   : > { %v1318_v51 = vadd.f32 %v1298_v49, %v1196_v47 }
 0x1b7   : > { %v1331_v54 = vadd.f32 %v2593_v61, %v1318_v51 }
 0x1b8   : > { %v1047_v55 = vpop.f32.mrf.mxu3 }
 0x1b9   : > { %v1065_v39 = vadd.f32 %v1047_v55, %v2568_v17  ;;  %v2616_v13 = vadd.f32 %v1340_v44, %v1331_v54  ;;  %v2291_v54 = vmov 0.0  }
 0x1bb   : > { %v1197_v1 = vadd.f32 %v1179_v27, %v1065_v39  ;;  %1361 = vadd.xlane.f32.xlu2 %v2616_v13  ;;  %v1342_v27 = vld [vmem:[%s2588_s16 + $0x28] sm:$0xff] }
 0x1bc   : > { %v1311_v60 = vpop.f32.mrf.mxu1 }
 0x1bd   : > { %v1319_v63 = vadd.f32 %v1301_v62, %v1197_v1 }
 0x1bf   : > { %v1332_v22 = vadd.f32 %v2593_v61, %v1319_v63 }
 0x1c0   : > { %v1049_v3 = vpop.f32.mrf.mxu3 }
 0x1c1   : > { %v1066_v49 = vadd.f32 %v1049_v3, %v2570_v19  ;;  %v2622_v5 = vadd.f32 %v1341_v0, %v1332_v22 }
 0x1c3   : > { %v1198_v15 = vadd.f32 %v2576_v37, %v1066_v49  ;;  %1363 = vadd.xlane.f32.xlu1 %v2622_v5 }
 0x1c4   : > { %v1313_v17 = vpop.f32.mrf.mxu1 }
 0x1c5   : > { %v1320_v6 = vadd.f32 %v1303_v11, %v1198_v15 }
 0x1c7   : > { %v1333_v45 = vadd.f32 %v2593_v61, %v1320_v6 }
 0x1c8   : > { %v1052_v62 = vpop.f32.mrf.mxu3 }
 0x1c9   : > { %v1067_v58 = vadd.f32 %v1052_v62, %v2572_v25  ;;  %v2629_v16 = vadd.f32 %v1342_v27, %v1333_v45  ;;  %v1344_v25 = vld [vmem:[%s2588_s16 + $0x38] sm:$0xff]  ;;  %s2223_s16 = scalar_lea.hbm %s2804_s9, 144 }
 0x1ca   : > { %p2225_p6 = scmp.lt.s32.totalorder %s2223_s16, %s2219_s25 }
 0x1cb   : > { %v1199_v18 = vadd.f32 %v2580_v46, %v1067_v58  ;;  %1365 = vadd.xlane.f32.xlu2 %v2629_v16 }
 0x1cc   : > { %p2226_p7 = por %p2225_p6, %p2224_p5 }
 0x1cd   : > { %v1321_v19 = vadd.f32 %v1306_v20, %v1199_v18 }
 0x1ce   : > { %p2227_p9 = pnand %p2226_p7, %p2222_p3 }
 0x1cf   : > { %v1334_v37 = vadd.f32 %v2593_v61, %v1321_v19 }
 0x1d0   : > { %v1054_v23 = vpop.f32.mrf.mxu3 }
 0x1d1   : > { %v1068_v11 = vadd.f32 %v1054_v23, %v2574_v30  ;;  %v1352_v7 = vadd.f32 %v1343_v59, %v1334_v37 }
 0x1d3   : > { %v1200_v12 = vadd.f32 %v2582_v52, %v1068_v11  ;;  %1367 = vadd.xlane.f32.xlu0 %v1352_v7  ;;  %v1391_v52 = vlaneseq }
 0x1d5   : > { %v1322_v53 = vadd.f32 %v1308_v50, %v1200_v12  ;;  %v1392_v51 = vand.u32 127, %v1391_v52 }
 0x1d7   : > { %v1335_v21 = vadd.f32 %v2593_v61, %v1322_v53  ;;  %vm1393_vm4 = vcmp.lt.s32.totalorder %v1392_v51, 16 }
 0x1d8   : > { %v1057_v8 = vpop.f32.mrf.mxu3  ;;  %v1998_v55 = vsel %vm1393_vm4, 1.0, %v2291_v54 }
 0x1d9   : > { %v1069_v46 = vadd.f32 %v1057_v8, %v2578_v43  ;;  %v1353_v38 = vadd.f32 %v1344_v25, %v1335_v21 }
 0x1db   : > { %v1201_v20 = vadd.f32 %v2596_v4, %v1069_v46  ;;  %1369 = vadd.xlane.f32.xlu1 %v1353_v38 }
 0x1dd   : > { %v1323_v28 = vadd.f32 %v1311_v60, %v1201_v20 }
 0x1df   : > { %v1336_v9 = vadd.f32 %v2593_v61, %v1323_v28 }
 0x1e0   : > { %v1059_v30 = vpop.f32.mrf.mxu3 }
 0x1e1   : > { %v1354_v47 = vadd.f32 %v1345_v41, %v1336_v9 }
 0x1e3   : > { %1371 = vadd.xlane.f32.xlu2 %v1354_v47 }
 0x216   : > { %v1356_v50 = vpop.xlane.xlu1 %1355 }
 0x217   : > { %v1373_v44 = vmul.f32 0.0625, %v1356_v50 }
 0x219   : > { %v1382_v43 = vsub.f32 %v2599_v26, %v1373_v44 }
 0x21b   : > { %v2644_v39 = vmul.f32 %v1998_v55, %v1382_v43 }
 0x21d   : > { %v1405_v4 = vmul.f32 %v2644_v39, %v2644_v39 }
 0x21e   : > { %v1358_v1 = vpop.xlane.xlu2 %1357 }
 0x21f   : > { %v1374_v60 = vmul.f32 0.0625, %v1358_v1  ;;  %1414 = vadd.xlane.f32.xlu0 %v1405_v4 }
 0x221   : > { %v1383_v61 = vsub.f32 %v2604_v24, %v1374_v60 }
 0x223   : > { %v2649_v63 = vmul.f32 %v1998_v55, %v1383_v61 }
 0x225   : > { %v1406_v0 = vmul.f32 %v2649_v63, %v2649_v63 }
 0x226   : > { %v1360_v22 = vpop.xlane.xlu0 %1359 }
 0x227   : > { %v1375_v3 = vmul.f32 0.0625, %v1360_v22  ;;  %1416 = vadd.xlane.f32.xlu1 %v1406_v0 }
 0x229   : > { %v1384_v26 = vsub.f32 %v2610_v14, %v1375_v3 }
 0x22b   : > { %v2654_v49 = vmul.f32 %v1998_v55, %v1384_v26 }
 0x22d   : > { %v1407_v15 = vmul.f32 %v2654_v49, %v2654_v49 }
 0x22e   : > { %v1362_v17 = vpop.xlane.xlu2 %1361 }
 0x22f   : > { %v1376_v6 = vmul.f32 0.0625, %v1362_v17  ;;  %1418 = vadd.xlane.f32.xlu2 %v1407_v15  ;;  %v2689_v17 = vld [vmem:[%s2802_s7] ss:$0 sm:$0xff] }
 0x231   : > { %v1385_v24 = vsub.f32 %v2616_v13, %v1376_v6 }
 0x233   : > { %v2659_v27 = vmul.f32 %v1998_v55, %v1385_v24 }
 0x235   : > { %v1408_v45 = vmul.f32 %v2659_v27, %v2659_v27 }
 0x236   : > { %v1364_v62 = vpop.xlane.xlu1 %1363 }
 0x237   : > { %v1377_v58 = vmul.f32 0.0625, %v1364_v62  ;;  %1420 = vadd.xlane.f32.xlu0 %v1408_v45  ;;  %v2694_v45 = vld [vmem:[%s2803_s8] ss:$0 sm:$0xff] }
 0x239   : > { %v1386_v14 = vsub.f32 %v2622_v5, %v1377_v58  ;;  %v1577_v58 = vrot.slane %v2492_v10, 2 }
 0x23b   : > { %v2664_v18 = vmul.f32 %v1998_v55, %v1386_v14  ;;  %v1576_v14 = vrot.slane %v2488_v2, 2 }
 0x23d   : > { %v1409_v19 = vmul.f32 %v2664_v18, %v2664_v18 }
 0x23e   : > { %v1366_v59 = vpop.xlane.xlu2 %1365 }
 0x23f   : > { %v1378_v37 = vmul.f32 0.0625, %v1366_v59  ;;  %1422 = vadd.xlane.f32.xlu1 %v1409_v19 }
 0x241   : > { %v1387_v13 = vsub.f32 %v2629_v16, %v1378_v37 }
 0x243   : > { %v2669_v23 = vmul.f32 %v1998_v55, %v1387_v13 }
 0x245   : > { %v1410_v11 = vmul.f32 %v2669_v23, %v2669_v23 }
 0x246   : > { %v1368_v12 = vpop.xlane.xlu0 %1367 }
 0x247   : > { %v1379_v53 = vmul.f32 0.0625, %v1368_v12  ;;  %1424 = vadd.xlane.f32.xlu2 %v1410_v11 }
 0x249   : > { %v1388_v25 = vsub.f32 %v1352_v7, %v1379_v53 }
 0x24b   : > { %v2673_v5 = vmul.f32 %v1998_v55, %v1388_v25 }
 0x24d   : > { %v1411_v21 = vmul.f32 %v2673_v5, %v2673_v5 }
 0x24e   : > { %v1370_v8 = vpop.xlane.xlu1 %1369 }
 0x24f   : > { %v1380_v46 = vmul.f32 0.0625, %v1370_v8  ;;  %1426 = vadd.xlane.f32.xlu0 %v1411_v21  ;;  %v1578_v21 = vsel %vm1219_vm0, %v1576_v14, %v1577_v58 }
 0x251   : > { %v1389_v20 = vsub.f32 %v1353_v38, %v1380_v46 }
 0x253   : > { %v2677_v28 = vmul.f32 %v1998_v55, %v1389_v20 }
 0x255   : > { %v1412_v16 = vmul.f32 %v2677_v28, %v2677_v28 }
 0x256   : > { %v1372_v41 = vpop.xlane.xlu2 %1371 }
 0x257   : > { %v1381_v9 = vmul.f32 0.0625, %v1372_v41  ;;  %1428 = vadd.xlane.f32.xlu1 %v1412_v16 }
 0x259   : > { %v1390_v30 = vsub.f32 %v1354_v47, %v1381_v9 }
 0x25b   : > { %v2681_v52 = vmul.f32 %v1998_v55, %v1390_v30 }
 0x25d   : > { %v1413_v7 = vmul.f32 %v2681_v52, %v2681_v52 }
 0x25f   : > { %1430 = vadd.xlane.f32.xlu2 %v1413_v7  ;;  %v1579_v7 = vrot.slane %v2502_v35, 2  ;;  %v1581_v35 = vrot.slane %v2508_v57, 2 }
 0x292   : > { %v1415_v51 = vpop.xlane.xlu0 %1414 }
 0x293   : > { %v1432_v50 = vmul.f32 0.0625, %v1415_v51 }
 0x295   : > { %v1441_v44 = vadd.f32 1e-05, %v1432_v50 }
 0x297   : > { %2155 = vrsqrt.f32 %v1441_v44  ;;  %vm1456_vm6 = vweird.f32 %v1441_v44 }
 0x29a   : > { %v1417_v38 = vpop.xlane.xlu1 %1416 }
 0x29b   : > { %v1433_v54 = vmul.f32 0.0625, %v1417_v38 }
 0x29d   : > { %v2156_v43 = vpop.eup %2155  ;;  %v1442_v4 = vadd.f32 1e-05, %v1433_v54  ;;  %v1580_v54 = vsel %vm1219_vm0, %v1577_v58, %v1579_v7 }
 0x29e   : > { %v1451_v1 = vmul.f32 %v2156_v43, %v1441_v44  ;;  %vm1457_vm5 = vweird.f32 %v2156_v43 }
 0x29f   : > { %2157 = vrsqrt.f32 %v1442_v4  ;;  %vm1458_vm7 = vmor %vm1456_vm6, %vm1457_vm5  ;;  %vm1466_vm9 = vweird.f32 %v1442_v4 }
 0x2a0   : > { %v1452_v60 = vmul.f32 %v2156_v43, %v1451_v1 }
 0x2a2   : > { %v1453_v61 = vmul.f32 0.5, %v1452_v60  ;;  %v1419_v47 = vpop.xlane.xlu2 %1418 }
 0x2a3   : > { %v1434_v55 = vmul.f32 0.0625, %v1419_v47 }
 0x2a4   : > { %v1454_v0 = vsub.f32 1.5, %v1453_v61 }
 0x2a5   : > { %v2158_v22 = vpop.eup %2157  ;;  %v1443_v3 = vadd.f32 1e-05, %v1434_v55 }
 0x2a6   : > { %v1455_v26 = vmul.f32 %v2156_v43, %v1454_v0  ;;  %v1461_v15 = vmul.f32 %v2158_v22, %v1442_v4  ;;  %vm1467_vm8 = vweird.f32 %v2158_v22 }
 0x2a7   : > { %2159 = vrsqrt.f32 %v1443_v3  ;;  %vm1468_vm10 = vmor %vm1466_vm9, %vm1467_vm8  ;;  %vm1476_vm12 = vweird.f32 %v1443_v3 }
 0x2a8   : > { %v1459_v6 = vsel %vm1458_vm7, %v2156_v43, %v1455_v26  ;;  %v1462_v24 = vmul.f32 %v2158_v22, %v1461_v15 }
 0x2a9   : > { %v1540_v62 = vmul.f32 %v1459_v6, %v2644_v39 }
 0x2aa   : > { %v1463_v19 = vmul.f32 0.5, %v1462_v24  ;;  %v1421_v59 = vpop.xlane.xlu0 %1420  ;;  %v1582_v24 = vsel %vm1219_vm0, %v1579_v7, %v1581_v35 }
 0x2ab   : > { %v1553_v37 = vmul.f32 %v2689_v17, %v1540_v62  ;;  %v1435_v13 = vmul.f32 0.0625, %v1421_v59 }
 0x2ac   : > { %v1464_v11 = vsub.f32 1.5, %v1463_v19 }
 0x2ad   : > { %v2160_v12 = vpop.eup %2159  ;;  %v1566_v53 = vadd.f32 %v2694_v45, %v1553_v37  ;;  %v1444_v25 = vadd.f32 1e-05, %v1435_v13 }
 0x2ae   : > { %v1465_v39 = vmul.f32 %v2158_v22, %v1464_v11  ;;  %v1471_v10 = vmul.f32 %v2160_v12, %v1443_v3  ;;  %vm1477_vm11 = vweird.f32 %v2160_v12 }
 0x2af   : > { %v1604_v8 = vmul.f32 %v1578_v21, %v1566_v53  ;;  %2161 = vrsqrt.f32 %v1444_v25  ;;  %vm1478_vm13 = vmor %vm1476_vm12, %vm1477_vm11  ;;  %vm1486_vm15 = vweird.f32 %v1444_v25 }
 0x2b0   : > { %v1469_v2 = vsel %vm1468_vm10, %v2158_v22, %v1465_v39  ;;  %v1472_v46 = vmul.f32 %v2160_v12, %v1471_v10  ;;  %v1584_v39 = vsel %vm1219_vm0, %v1581_v35, %v1583_v32 }
 0x2b1   : > { %1613 = vst [vmem:[%s2704_s28] sm:$0xff] %v1604_v8  ;;  %v1541_v20 = vmul.f32 %v1469_v2, %v2649_v63 }
 0x2b2   : > { %v1473_v16 = vmul.f32 0.5, %v1472_v46  ;;  %v1423_v41 = vpop.xlane.xlu1 %1422 }
 0x2b3   : > { %v1554_v9 = vmul.f32 %v2689_v17, %v1541_v20  ;;  %v1436_v30 = vmul.f32 0.0625, %v1423_v41 }
 0x2b4   : > { %v1474_v51 = vsub.f32 1.5, %v1473_v16 }
 0x2b5   : > { %v2162_v50 = vpop.eup %2161  ;;  %v1567_v44 = vadd.f32 %v2694_v45, %v1554_v9  ;;  %v1445_v38 = vadd.f32 1e-05, %v1436_v30 }
 0x2b6   : > { %v1475_v43 = vmul.f32 %v2160_v12, %v1474_v51  ;;  %v1481_v4 = vmul.f32 %v2162_v50, %v1444_v25  ;;  %vm1487_vm14 = vweird.f32 %v2162_v50 }
 0x2b7   : > { %v1605_v63 = vmul.f32 %v1580_v54, %v1567_v44  ;;  %2163 = vrsqrt.f32 %v1445_v38  ;;  %vm1488_vm1 = vmor %vm1486_vm15, %vm1487_vm14  ;;  %vm1496_vm3 = vweird.f32 %v1445_v38 }
 0x2b8   : > { %v1479_v1 = vsel %vm1478_vm13, %v2160_v12, %v1475_v43  ;;  %v1482_v60 = vmul.f32 %v2162_v50, %v1481_v4  ;;  %v1587_v4 = vrot.slane %v2452_v31, 2 }
 0x2b9   : > { %1614 = vst [vmem:[%s2704_s28 + $0x8] sm:$0xff] %v1605_v63  ;;  %v1542_v61 = vmul.f32 %v1479_v1, %v2654_v49 }
 0x2ba   : > { %v1483_v47 = vmul.f32 0.5, %v1482_v60  ;;  %v1425_v55 = vpop.xlane.xlu2 %1424 }
 0x2bb   : > { %v1555_v0 = vmul.f32 %v2689_v17, %v1542_v61  ;;  %v1437_v22 = vmul.f32 0.0625, %v1425_v55 }
 0x2bc   : > { %v1484_v26 = vsub.f32 1.5, %v1483_v47 }
 0x2bd   : > { %v2164_v3 = vpop.eup %2163  ;;  %v1568_v15 = vadd.f32 %v2694_v45, %v1555_v0  ;;  %v1446_v6 = vadd.f32 1e-05, %v1437_v22  ;;  %v1588_v0 = vsel %vm1219_vm0, %v1585_v34, %v1587_v4 }
 0x2be   : > { %v1485_v62 = vmul.f32 %v2162_v50, %v1484_v26  ;;  %v1491_v58 = vmul.f32 %v2164_v3, %v1445_v38  ;;  %vm1497_vm2 = vweird.f32 %v2164_v3 }
 0x2bf   : > { %v1606_v49 = vmul.f32 %v1582_v24, %v1568_v15  ;;  %2165 = vrsqrt.f32 %v1446_v6  ;;  %vm1498_vm4 = vmor %vm1496_vm3, %vm1497_vm2  ;;  %vm1506_vm6 = vweird.f32 %v1446_v6 }
 0x2c0   : > { %v1489_v57 = vsel %vm1488_vm1, %v2162_v50, %v1485_v62  ;;  %v1492_v14 = vmul.f32 %v2164_v3, %v1491_v58  ;;  %v1590_v58 = vsel %vm1219_vm0, %v1587_v4, %v1589_v42 }
 0x2c1   : > { %1615 = vst [vmem:[%s2704_s28 + $0x10] sm:$0xff] %v1606_v49  ;;  %v1543_v19 = vmul.f32 %v1489_v57, %v2659_v27 }
 0x2c2   : > { %v1493_v59 = vmul.f32 0.5, %v1492_v14  ;;  %v1427_v37 = vpop.xlane.xlu0 %1426 }
 0x2c3   : > { %v1556_v13 = vmul.f32 %v2689_v17, %v1543_v19  ;;  %v1438_v11 = vmul.f32 0.0625, %v1427_v37 }
 0x2c4   : > { %v1494_v12 = vsub.f32 1.5, %v1493_v59 }
 0x2c5   : > { %v2166_v53 = vpop.eup %2165  ;;  %v1569_v25 = vadd.f32 %v2694_v45, %v1556_v13  ;;  %v1447_v21 = vadd.f32 1e-05, %v1438_v11 }
 0x2c6   : > { %v1495_v10 = vmul.f32 %v2164_v3, %v1494_v12  ;;  %v1501_v8 = vmul.f32 %v2166_v53, %v1446_v6  ;;  %vm1507_vm5 = vweird.f32 %v2166_v53 }
 0x2c7   : > { %v1607_v27 = vmul.f32 %v1584_v39, %v1569_v25  ;;  %2167 = vrsqrt.f32 %v1447_v21  ;;  %vm1508_vm7 = vmor %vm1506_vm6, %vm1507_vm5  ;;  %vm1516_vm9 = vweird.f32 %v1447_v21 }
 0x2c8   : > { %v1499_v2 = vsel %vm1498_vm4, %v2164_v3, %v1495_v10  ;;  %v1502_v46 = vmul.f32 %v2166_v53, %v1501_v8 }
 0x2c9   : > { %1616 = vst [vmem:[%s2704_s28 + $0x18] sm:$0xff] %v1607_v27  ;;  %v1544_v20 = vmul.f32 %v1499_v2, %v2664_v18 }
 0x2ca   : > { %v1503_v16 = vmul.f32 0.5, %v1502_v46  ;;  %v1429_v41 = vpop.xlane.xlu1 %1428 }
 0x2cb   : > { %v1557_v9 = vmul.f32 %v2689_v17, %v1544_v20  ;;  %v1439_v30 = vmul.f32 0.0625, %v1429_v41 }
 0x2cc   : > { %v1504_v29 = vsub.f32 1.5, %v1503_v16 }
 0x2cd   : > { %v2168_v32 = vpop.eup %2167  ;;  %v1570_v7 = vadd.f32 %v2694_v45, %v1557_v9  ;;  %v1448_v51 = vadd.f32 1e-05, %v1439_v30 }
 0x2ce   : > { %v1505_v50 = vmul.f32 %v2166_v53, %v1504_v29  ;;  %v1511_v44 = vmul.f32 %v2168_v32, %v1447_v21  ;;  %vm1517_vm8 = vweird.f32 %v2168_v32 }
 0x2cf   : > { %v1608_v38 = vmul.f32 %v2463_v36, %v1570_v7  ;;  %2169 = vrsqrt.f32 %v1448_v51  ;;  %vm1518_vm10 = vmor %vm1516_vm9, %vm1517_vm8  ;;  %vm1526_vm12 = vweird.f32 %v1448_v51 }
 0x2d0   : > { %v1509_v18 = vsel %vm1508_vm7, %v2166_v53, %v1505_v50  ;;  %v1512_v54 = vmul.f32 %v2168_v32, %v1511_v44 }
 0x2d1   : > { %1617 = vst [vmem:[%s2704_s28 + $0x20] sm:$0xff] %v1608_v38  ;;  %v1545_v43 = vmul.f32 %v1509_v18, %v2669_v23 }
 0x2d2   : > { %v1513_v63 = vmul.f32 0.5, %v1512_v54  ;;  %v1431_v1 = vpop.xlane.xlu2 %1430 }
 0x2d3   : > { %v1558_v60 = vmul.f32 %v2689_v17, %v1545_v43  ;;  %v1440_v61 = vmul.f32 0.0625, %v1431_v1 }
 0x2d4   : > { %v1514_v35 = vsub.f32 1.5, %v1513_v63 }
 0x2d5   : > { %v2170_v47 = vpop.eup %2169  ;;  %v1571_v36 = vadd.f32 %v2694_v45, %v1558_v60  ;;  %v1449_v55 = vadd.f32 1e-05, %v1440_v61 }
 0x2d6   : > { %v1515_v22 = vmul.f32 %v2168_v32, %v1514_v35  ;;  %v1521_v23 = vmul.f32 %v2170_v47, %v1448_v51  ;;  %vm1527_vm11 = vweird.f32 %v2170_v47 }
 0x2d7   : > { %v1609_v31 = vmul.f32 %v1588_v0, %v1571_v36  ;;  %2171 = vrsqrt.f32 %v1449_v55  ;;  %vm1528_vm13 = vmor %vm1526_vm12, %vm1527_vm11  ;;  %vm1536_vm0 = vweird.f32 %v1449_v55 }
 0x2d8   : > { %v1519_v26 = vsel %vm1518_vm10, %v2168_v32, %v1515_v22  ;;  %v1522_v3 = vmul.f32 %v2170_v47, %v1521_v23 }
 0x2d9   : > { %1618 = vst [vmem:[%s2704_s28 + $0x28] sm:$0xff] %v1609_v31  ;;  %v1546_v15 = vmul.f32 %v1519_v26, %v2673_v5 }
 0x2da   : > { %v1523_v6 = vmul.f32 0.5, %v1522_v3 }
 0x2db   : > { %v1559_v24 = vmul.f32 %v2689_v17, %v1546_v15 }
 0x2dc   : > { %v1524_v62 = vsub.f32 1.5, %v1523_v6 }
 0x2dd   : > { %v2172_v33 = vpop.eup %2171  ;;  %v1572_v34 = vadd.f32 %v2694_v45, %v1559_v24 }
 0x2de   : > { %v1525_v49 = vmul.f32 %v2170_v47, %v1524_v62  ;;  %v1531_v57 = vmul.f32 %v2172_v33, %v1449_v55  ;;  %vm1537_vm14 = vweird.f32 %v2172_v33 }
 0x2df   : > { %v1610_v14 = vmul.f32 %v1590_v58, %v1572_v34  ;;  %vm1538_vm15 = vmor %vm1536_vm0, %vm1537_vm14 }
 0x2e0   : > { %v1529_v5 = vsel %vm1528_vm13, %v2170_v47, %v1525_v49  ;;  %v1532_v19 = vmul.f32 %v2172_v33, %v1531_v57 }
 0x2e1   : > { %1619 = vst [vmem:[%s2704_s28 + $0x30] sm:$0xff] %v1610_v14  ;;  %v1547_v59 = vmul.f32 %v1529_v5, %v2677_v28 }
 0x2e2   : > { %v1533_v37 = vmul.f32 0.5, %v1532_v19 }
 0x2e3   : > { %v1560_v13 = vmul.f32 %v2689_v17, %v1547_v59 }
 0x2e4   : > { %v1534_v11 = vsub.f32 1.5, %v1533_v37 }
 0x2e5   : > { %v1573_v40 = vadd.f32 %v2694_v45, %v1560_v13 }
 0x2e6   : > { %v1535_v42 = vmul.f32 %v2172_v33, %v1534_v11 }
 0x2e7   : > { %v1611_v12 = vmul.f32 %v2474_v48, %v1573_v40 }
 0x2e8   : > { %v1539_v53 = vsel %vm1538_vm15, %v2172_v33, %v1535_v42 }
 0x2e9   : > { %1620 = vst [vmem:[%s2704_s28 + $0x38] sm:$0xff] %v1611_v12  ;;  %v1548_v28 = vmul.f32 %v1539_v53, %v2681_v52 }
 0x2eb   : > { %v1561_v25 = vmul.f32 %v2689_v17, %v1548_v28 }
 0x2ed   : > { %v1574_v21 = vadd.f32 %v2694_v45, %v1561_v25 }
 0x2ef   : > { %v1612_v39 = vmul.f32 %v2480_v56, %v1574_v21 }
 0x2f1   : > { %1621 = vst [vmem:[%s2704_s28 + $0x40] sm:$0xff] %v1612_v39 }
 0x2f2   : > { %2230 = shalt.err (!%p2227_p9)
}
 0x2f3   : > { %s2292_s15 = smov 128   ;;  %s2293_s28 = smov 8  }
 0x2f4   : > { %2080 = dma.vmem_to_hbm [thread:$0]  (%p2384_p4), %s1638_s23, 1152, %s1640_s12, %s1623_s24, %s2292_s15, %s2292_s15, %s2293_s28  }
 0x2f5 PF: > { %p2092_p10 = scmp.ge.s32.totalorder %s2285_s14, 2  ;;  %s1654_s27 = sand.u32 1, %s2265_s30  }
 0x2f6   : > { %s1655_s29 = scalar_lea.sflag [#allocation4], %s1654_s27 }
 0x2f7   : > { %p2087_p11 = pnand %p2092_p10, %p2391_p8 }
 0x2f9   : > { %p2088_p12 = pneg %p2087_p11 }
 0x2fb   : > { %2260 = dma.done.wait (%p2088_p12), %s1655_s29, 1152  }
 0x2fc   : > { %2262 = vsyncadd (%p2088_p12), %s1655_s29, 4294966144  ;;  %s23_s14 = sadd.s32 1, %s2285_s14   ;;  %s2807_s30 = smov %s2269_s10 }
 0x2fd   : > { %p20_p13 = scmp.ge.s32.totalorder %s23_s14, 4   ;;  %s2808_s10 = smov %s2273_s11 }
 0x2fe   : > { %s2809_s11 = smov %s2397_s22  ;;  %s2810_s12 = smov %s2281_s13 }
 0x2ff   : > { %s2811_s13 = smov %s2813_s17  ;;  %22 = sbr.rel (!%p20_p13) target bundleno = 5 (0x5), region = 106 }
 0x304   :  { %1661 = vsyncpa [#allocation3], 1 }
 0x305   :  { %1663 = vsyncpa [#allocation3 + $0x1], 1 }
 0x306   :  { %1664 = vsyncpa [#allocation4], 1 }
 0x307   :  { %1666 = vsyncpa [#allocation4 + $0x1], 1 }

</bundles_post_ra>
